<compile_context>
chip_gen: v6e
topology: v6e:2x2x1
jax: 0.10.0
libtpu: 0.0.40
codegen_flags: <defaults>
</compile_context>

<pallas_src>
import functools

import jax
import jax.numpy as jnp
from jax import lax
from jax.experimental import pallas as pl
from jax.experimental.pallas import tpu as pltpu


def _round_up(x, m):
    return ((x + m - 1) // m) * m


def _leaky(x):
    return jnp.where(x > 0, x, 0.01 * x)


def _vmem_capacity():
    try:
        return int(pltpu.get_tpu_info().vmem_capacity_bytes)
    except Exception:
        return 64 << 20          # conservative default (v7x-sized)


def _default_shards():
    # 2 TensorCores only on v7x; the parallel shard axis is pure overhead on
    # the single-TC v5e / v6e chips.
    try:
        kind = jax.devices()[0].device_kind.lower()
    except Exception:
        return 1
    return 2 if ("v7" in kind or "7x" in kind) else 1


def _pick_tile(tile_cap, vmem_limit, n_node, n_tot, bigp, dim, payw):
    """Largest edge tile (multiple of 128) fitting a conservative VMEM budget."""
    width = bigp + _round_up(dim, 128)            # lane-padded gather-table width
    per_edge = (2 * 128 * 4                       # idx block (lane-padded, x2 bufs)
                + 2 * 8 * 4                       # obj row  (sublane-padded, x2)
                + n_tot * 4                       # three-hot gather matrix
                + _round_up(n_node, 8) * 4        # scatter one-hot column
                + (width + 10 * payw) * 4)        # gathered slab + temporaries
    fixed = (2 * n_tot * width * 4                # resident table (x2 bufs)
             + 2 * n_node * payw * 4              # resident accumulator (x2)
             + (2 << 20))                         # weights / slack
    budget = int(vmem_limit * 0.5)
    tile = (max(budget - fixed, 0) // per_edge) // 128 * 128
    tile_cap = max(128, (tile_cap // 128) * 128)
    return int(max(128, min(tile, tile_cap)))


# ---------------------------------------------------------------------------
# Pallas kernel: in-VMEM gather + gate + attention + exp-weighted scatter-sum
# ---------------------------------------------------------------------------
def _tgnn_kernel(idx_ref, obj_ref, tbl_ref, wt2_ref, wa_ref, out_ref, *,
                 dim, attn, bigp, n_node, payw):
    j = pl.program_id(1)

    @pl.when(j == 0)
    def _():
        out_ref[...] = jnp.zeros_like(out_ref)

    idx = idx_ref[...]                                   # [tile, 3] int32
    tile = idx.shape[0]
    n_tot = tbl_ref.shape[0]

    # --- in-kernel gather: one three-hot matmul yields [big_preact | hs] -----
    cols = lax.broadcasted_iota(jnp.int32, (tile, n_tot), 1)
    hot = ((cols == idx[:, 0:1]) | (cols == idx[:, 1:2])
           | (cols == idx[:, 2:3])).astype(jnp.float32)          # [tile, n_tot]
    g = jnp.dot(hot, tbl_ref[...], preferred_element_type=jnp.float32)
    bigv = g[:, :bigp]          # [update | reset | attention | hr@Wt1+bt | pad]
    hs = g[:, bigp:bigp + dim]                                   # [tile, D]

    # --- GateUnit (GRU-style), sigmoids fused into one 2D-wide EUP call ------
    ur = jax.nn.sigmoid(bigv[:, :2 * dim])
    u, r = ur[:, :dim], ur[:, dim:]
    att_pre = bigv[:, 2 * dim:2 * dim + attn]
    hrt = bigv[:, 2 * dim + attn:3 * dim + attn]

    cand = jnp.tanh(hrt + jnp.dot(r * hs, wt2_ref[...],
                                  preferred_element_type=jnp.float32))
    message = (1.0 - u) * hs + u * cand                          # [tile, D]

    # --- attention: alpha = w_alpha(LeakyReLU(att_pre)); exp for softmax agg -
    att = _leaky(att_pre)
    alpha = jnp.sum(att * wa_ref[...], axis=-1, keepdims=True)   # VPU + lane red
    # NOTE: plain exp (no max-shift) matches the PyTorch reference exactly.
    ea = jnp.exp(alpha)                                          # [tile, 1]

    # --- lane-dense payload: [exp*message | exp | 0-pad] -> one scatter matmul
    payload = jnp.concatenate(
        [ea * message, ea,
         jnp.zeros((tile, payw - dim - 1), jnp.float32)], axis=1)  # [tile, payw]

    # pre-transposed one-hot: nodes on sublanes, edges on lanes (no transpose)
    node_ids = lax.broadcasted_iota(jnp.int32, (n_node, tile), 0)
    onehot_t = (node_ids == obj_ref[...]).astype(jnp.float32)    # [n_node, tile]

    out_ref[...] += jnp.dot(onehot_t, payload,
                            preferred_element_type=jnp.float32)[None]


# ---------------------------------------------------------------------------
# Wrapper
# ---------------------------------------------------------------------------
def tgnn_layer_pallas(q_rel, hidden, edges, n_node, params, *,
                      tile_e=4096, n_shards=None):
    p = params
    f32 = jnp.float32
    hidden = hidden.astype(f32)
    D = p["rela_embed"].shape[1]
    A = p["Ws"].shape[1]
    rel_tab = p["rela_embed"].astype(f32)
    time_tab = p["time_embed"].astype(f32)
    R, T = rel_tab.shape[0], time_tab.shape[0]
    n_prev = hidden.shape[0]
    n_q = q_rel.shape[0]

    # ---- hoisted fuse-MLP: hr table over all (rel, time) pairs (== unique) --
    rel_x = jnp.repeat(rel_tab, T, axis=0)                       # [R*T, D]
    time_x = jnp.tile(time_tab, (R, 1))                          # [R*T, D/4]
    h = _leaky(jnp.concatenate([rel_x, time_x], axis=1) @ p["W1"] + p["b1"])
    h = _leaky(h @ p["W2"] + p["b2"])
    hr_table = h + rel_x                                         # [R*T, D]
    hqr_table = rel_tab[q_rel]                                   # [n_q, D]

    # ---- fused gate/attn/Wt1 weights, split by source (hs / hr / hqr) -------
    Wg, Wt = p["Wg"].astype(f32), p["Wt"].astype(f32)
    Wt1, Wt2 = Wt[:D], Wt[D:]
    zDD = jnp.zeros((D, D), f32)
    # column layout: [update (D) | reset (D) | attention (A) | hr@Wt1 (D)]
    W_hs = jnp.concatenate([Wg[2 * D:3 * D, :D], Wg[2 * D:3 * D, D:],
                            p["Ws"], zDD], axis=1)
    W_hr = jnp.concatenate([Wg[:D, :D], Wg[:D, D:], p["Wr"], Wt1], axis=1)
    W_hqr = jnp.concatenate([Wg[D:2 * D, :D], Wg[D:2 * D, D:],
                             p["Wqr"], zDD], axis=1)
    b_big = jnp.concatenate([p["bg"][:D], p["bg"][D:],
                             p["bqr"], p["bt"]])[None, :]        # [1, 3D+A]

    BIG = 3 * D + A
    BIGP = _round_up(BIG, 128)
    PAYW = _round_up(D + 1, 128)

    # ---- VMEM-resident gather table -----------------------------------------
    # rows:    [hidden | hr_table | hqr_table]
    # columns: [projected-through-fused-weights (bias folded into hqr block) | hs]
    proj = jnp.concatenate([hidden @ W_hs,
                            hr_table @ W_hr,
                            hqr_table @ W_hqr + b_big], axis=0)          # [N0, BIG]
    hs_cols = jnp.concatenate([hidden,
                               jnp.zeros((R * T + n_q, D), f32)], axis=0)
    N0 = n_prev + R * T + n_q
    tbl = jnp.concatenate(
        [proj, jnp.zeros((N0, BIGP - BIG), f32), hs_cols], axis=1)  # [N0, BIGP+D]
    N_tot = _round_up(N0, 8)
    tbl = jnp.pad(tbl, ((0, N_tot - N0), (0, 0)))

    wa_row = p["wA"].T.astype(f32)                                   # [1, A]

    # ---- per-edge int32 streams (only thing streamed from HBM per edge) -----
    r_idx, rel, sub, obj, t = (edges[:, 0], edges[:, 2], edges[:, 4],
                               edges[:, 5], edges[:, 6])
    idx = jnp.stack([sub,
                     n_prev + rel * T + t,
                     n_prev + R * T + r_idx], axis=1).astype(jnp.int32)  # [E, 3]

    # ---- tiling: VMEM budget + small-E fallback ------------------------------
    E = edges.shape[0]
    if n_shards is None:
        n_shards = _default_shards()
    vmem_cap = _vmem_capacity()
    vmem_limit = max(32 << 20, min(vmem_cap // 2, 64 << 20))
    tile = _pick_tile(tile_e, vmem_limit, n_node, N_tot, BIGP, D, PAYW)
    if E < n_shards * tile:                       # don't pad tiny edge sets up
        n_shards = 1
        tile = max(128, min(tile, _round_up(E, 128)))
    E_pad = _round_up(E, n_shards * tile)
    n_steps = E_pad // (n_shards * tile)

    idx = jnp.pad(idx, ((0, E_pad - E), (0, 0)))      # pad edges -> row 0 (harmless)
    obj_row = jnp.concatenate(
        [obj.astype(jnp.int32),
         jnp.full((E_pad - E,), n_node, jnp.int32)])[None, :]        # sentinel obj

    kernel = functools.partial(_tgnn_kernel, dim=D, attn=A, bigp=BIGP,
                               n_node=n_node, payw=PAYW)

    edge_map = lambda c, j: (c * n_steps + j, 0)
    obj_map = lambda c, j: (0, c * n_steps + j)
    full_map = lambda c, j: (0, 0)

    partial_acc = pl.pallas_call(
        kernel,
        out_shape=jax.ShapeDtypeStruct((n_shards, n_node, PAYW), jnp.float32),
        grid=(n_shards, n_steps),
        in_specs=[
            pl.BlockSpec((tile, 3), edge_map),           # gather indices
            pl.BlockSpec((1, tile), obj_map),            # scatter index (lanes)
            pl.BlockSpec((N_tot, BIGP + D), full_map),   # resident gather table
            pl.BlockSpec((D, D), full_map),              # Wt2
            pl.BlockSpec((1, A), full_map),              # w_alpha
        ],
        out_specs=pl.BlockSpec((1, n_node, PAYW), lambda c, j: (c, 0, 0)),
        compiler_params=pltpu.CompilerParams(
            dimension_semantics=("parallel", "arbitrary"),
            vmem_limit_bytes=int(vmem_limit)),
    )(idx, obj_row, tbl, Wt2, wa_row)

    # ---- epilogue: combine shards, softmax-style normalize, W_h -------------
    acc = partial_acc.sum(axis=0)                                    # [n_node, PAYW]
    num, den = acc[:, :D], acc[:, D:D + 1] + 1e-5
    return (num / den) @ p["Wh"]                                     # act = idd


# ---------------------------------------------------------------------------
# Pure-JAX reference (mirrors the PyTorch TimelineGNNLayer3 forward exactly)
# ---------------------------------------------------------------------------
def tgnn_layer_reference(q_rel, hidden, edges, n_node, p):
    D = p["rela_embed"].shape[1]
    rel_e = p["rela_embed"][edges[:, 2]]
    time_e = p["time_embed"][edges[:, 6]]
    h = _leaky(jnp.concatenate([rel_e, time_e], axis=1) @ p["W1"] + p["b1"])
    h = _leaky(h @ p["W2"] + p["b2"])
    hr = h + rel_e
    hs = hidden[edges[:, 4]]
    hqr = p["rela_embed"][q_rel][edges[:, 0]]
    # GateUnit(message=hr, factor=hqr, hidden_state=hs)
    gates = jax.nn.sigmoid(jnp.concatenate([hr, hqr, hs], axis=1) @ p["Wg"]
                           + p["bg"])
    u, r = gates[:, :D], gates[:, D:]
    cand = jnp.tanh(jnp.concatenate([hr, r * hs], axis=1) @ p["Wt"] + p["bt"])
    message = (1.0 - u) * hs + u * cand
    att = _leaky(hs @ p["Ws"] + hr @ p["Wr"] + hqr @ p["Wqr"] + p["bqr"])
    ea = jnp.exp(att @ p["wA"])
    up = jax.ops.segment_sum(ea * message, edges[:, 5], num_segments=n_node)
    bot = jax.ops.segment_sum(ea, edges[:, 5], num_segments=n_node) + 1e-5
    return (up / bot) @ p["Wh"]


# ---------------------------------------------------------------------------
# Deterministic parameter construction (weights stored [in, out])
# ---------------------------------------------------------------------------
def make_params(key, in_dim, out_dim, attn_dim, n_rel, max_hist):
    D, A, d4 = in_dim, attn_dim, in_dim // 4
    ks = jax.random.split(key, 20)

    def lin(k, fi, fo):
        b = 1.0 / jnp.sqrt(fi)
        return jax.random.uniform(k, (fi, fo), jnp.float32, -b, b)

    def bias(k, fi, fo):
        b = 1.0 / jnp.sqrt(fi)
        return jax.random.uniform(k, (fo,), jnp.float32, -b, b)

    # sinusoidal TimeEncoding (fixed, non-trainable)
    pos = jnp.arange(max_hist, dtype=jnp.float32)[:, None]
    div = jnp.exp(jnp.arange(0, d4, 2, dtype=jnp.float32)
                  * -(jnp.log(10000.0) / d4))
    pe = jnp.zeros((max_hist, d4), jnp.float32)
    pe = pe.at[:, 0::2].set(jnp.sin(pos * div))
    pe = pe.at[:, 1::2].set(jnp.cos(pos * div))

    return {
        "rela_embed": jax.random.normal(ks[0], (2 * n_rel + 1, D), jnp.float32),
        "time_embed": pe,
        "W1": lin(ks[1], d4 * 5, D), "b1": bias(ks[2], d4 * 5, D),
        "W2": lin(ks[3], D, D), "b2": bias(ks[4], D, D),
        "Ws": lin(ks[5], D, A), "Wr": lin(ks[6], D, A),
        "Wqr": lin(ks[7], D, A), "bqr": bias(ks[8], D, A),
        "wA": lin(ks[9], A, 1),
        # GateUnit: gate_W [3D -> 2D] (rows: hr | hqr | hs), hidden_trans [2D -> D]
        "Wg": lin(ks[10], 3 * D, 2 * D), "bg": bias(ks[11], 3 * D, 2 * D),
        "Wt": lin(ks[12], 2 * D, D), "bt": bias(ks[13], 2 * D, D),
        "Wh": lin(ks[14], D, out_dim),
    }


if __name__ == "__main__":
    in_dim, out_dim, attn_dim = 32, 32, 16
    n_rel, max_hist = 5, 16
    E, n_node, n_prev, n_q = 64, 16, 24, 4

    key = jax.random.PRNGKey(0)
    kp, kh, ke, kq = jax.random.split(key, 4)

    params = make_params(kp, in_dim, out_dim, attn_dim, n_rel, max_hist)
    hidden = jax.random.normal(kh, (n_prev, in_dim), jnp.float32)
    q_rel = jax.random.randint(kq, (n_q,), 0, 2 * n_rel + 1, jnp.int32)

    ek = jax.random.split(ke, 5)
    edges = jnp.zeros((E, 7), jnp.int32)
    edges = edges.at[:, 0].set(jax.random.randint(ek[0], (E,), 0, n_q, jnp.int32))            # r_idx
    edges = edges.at[:, 2].set(jax.random.randint(ek[1], (E,), 0, 2 * n_rel + 1, jnp.int32))  # rel
    edges = edges.at[:, 4].set(jax.random.randint(ek[2], (E,), 0, n_prev, jnp.int32))         # sub
    edges = edges.at[:, 5].set(jax.random.randint(ek[3], (E,), 0, n_node, jnp.int32))         # obj
    edges = edges.at[:, 6].set(jax.random.randint(ek[4], (E,), 0, max_hist, jnp.int32))       # time

    out = jax.block_until_ready(
        tgnn_layer_pallas(q_rel, hidden, edges, n_node, params))
    ref = jax.block_until_ready(
        tgnn_layer_reference(q_rel, hidden, edges, n_node, params))

    if not jnp.allclose(out, ref, rtol=1e-3, atol=1e-3):
        raise AssertionError(
            f"Pallas/ref mismatch, max abs err = {jnp.max(jnp.abs(out - ref))}")

    print("KERNEL_OK")
</pallas_src>

<mosaic_0001>
module attributes {stable_mosaic.version = 11 : i64} {
  func.func @_tgnn_kernel(%arg0: i32, %arg1: i32, %arg2: memref<128x3xi32, #tpu.memory_space<vmem>>, %arg3: memref<1x128xi32, #tpu.memory_space<vmem>>, %arg4: memref<208x160xf32, #tpu.memory_space<vmem>>, %arg5: memref<32x32xf32, #tpu.memory_space<vmem>>, %arg6: memref<1x16xf32, #tpu.memory_space<vmem>>, %arg7: memref<1x16x128xf32, #tpu.memory_space<vmem>>) attributes {dimension_semantics = [#tpu.dimension_semantics<parallel>, #tpu.dimension_semantics<arbitrary>], iteration_bounds = array<i64: 1, 1>, scalar_prefetch = 0 : i64, scratch_operands = 0 : i64, tpu.core_type = #tpu.core_type<tc>, window_params = [{transform_indices = @transform_0, window_bounds = array<i64: 128, 3>}, {transform_indices = @transform_1, window_bounds = array<i64: 1, 128>}, {pipeline_mode = #tpu.pipeline_mode<synchronous>, transform_indices = @transform_2, window_bounds = array<i64: 208, 160>}, {pipeline_mode = #tpu.pipeline_mode<synchronous>, transform_indices = @transform_3, window_bounds = array<i64: 32, 32>}, {pipeline_mode = #tpu.pipeline_mode<synchronous>, transform_indices = @transform_4, window_bounds = array<i64: 1, 16>}, {transform_indices = @transform_5, window_bounds = array<i64: 1, 16, 128>}]} {
    %c0_i32 = arith.constant 0 : i32
    %0 = arith.cmpi eq, %arg1, %c0_i32 : i32
    %1 = arith.extui %0 : i1 to i32
    %c0_i32_0 = arith.constant 0 : i32
    %2 = arith.cmpi ne, %1, %c0_i32_0 : i32
    scf.if %2 {
      %cst_24 = arith.constant 0.000000e+00 : f32
      %68 = vector.broadcast %cst_24 : f32 to vector<1x16x128xf32>
      %c0_25 = arith.constant 0 : index
      %c0_26 = arith.constant 0 : index
      %c0_27 = arith.constant 0 : index
      %69 = vector.load %arg7[%c0_25, %c0_26, %c0_27] : memref<1x16x128xf32, #tpu.memory_space<vmem>>, vector<1x16x128xf32>
      tpu.vector_store %arg7[%c0_25, %c0_26, %c0_27], %68 {strides = array<i32>} : memref<1x16x128xf32, #tpu.memory_space<vmem>>, vector<1x16x128xf32>,
    } else {
    }
    %c0 = arith.constant 0 : index
    %c0_1 = arith.constant 0 : index
    %3 = vector.load %arg2[%c0, %c0_1] : memref<128x3xi32, #tpu.memory_space<vmem>>, vector<128x3xi32>
    %4 = tpu.iota {dimensions = array<i32: 1>} : vector<128x208xi32>
    %5 = vector.extract_strided_slice %3 {offsets = [0, 0], sizes = [128, 1], strides = [1, 1]} : vector<128x3xi32> to vector<128x1xi32>
    %6 = vector.broadcast %5 : vector<128x1xi32> to vector<128x208xi32>
    %7 = arith.cmpi eq, %4, %6 : vector<128x208xi32>
    %8 = vector.extract_strided_slice %3 {offsets = [0, 1], sizes = [128, 1], strides = [1, 1]} : vector<128x3xi32> to vector<128x1xi32>
    %9 = vector.broadcast %8 : vector<128x1xi32> to vector<128x208xi32>
    %10 = arith.cmpi eq, %4, %9 : vector<128x208xi32>
    %11 = arith.ori %7, %10 : vector<128x208xi1>
    %12 = vector.extract_strided_slice %3 {offsets = [0, 2], sizes = [128, 1], strides = [1, 1]} : vector<128x3xi32> to vector<128x1xi32>
    %13 = vector.broadcast %12 : vector<128x1xi32> to vector<128x208xi32>
    %14 = arith.cmpi eq, %4, %13 : vector<128x208xi32>
    %15 = arith.ori %11, %14 : vector<128x208xi1>
    %16 = arith.extui %15 : vector<128x208xi1> to vector<128x208xi32>
    %17 = arith.sitofp %16 : vector<128x208xi32> to vector<128x208xf32>
    %c0_2 = arith.constant 0 : index
    %c0_3 = arith.constant 0 : index
    %18 = vector.load %arg4[%c0_2, %c0_3] : memref<208x160xf32, #tpu.memory_space<vmem>>, vector<208x160xf32>
    %cst = arith.constant dense<0.000000e+00> : vector<128x160xf32>
    %19 = tpu.matmul %17, %18, %cst {dimension_numbers = #tpu.dot_dimension_numbers<[1], [0], [0], [1], [0, 0, 1, 1], [], []>} : vector<128x208xf32>, vector<208x160xf32>, vector<128x160xf32> -> vector<128x160xf32>
    %20 = vector.extract_strided_slice %19 {offsets = [0, 0], sizes = [128, 128], strides = [1, 1]} : vector<128x160xf32> to vector<128x128xf32>
    %21 = vector.extract_strided_slice %19 {offsets = [0, 128], sizes = [128, 32], strides = [1, 1]} : vector<128x160xf32> to vector<128x32xf32>
    %22 = vector.extract_strided_slice %20 {offsets = [0, 0], sizes = [128, 64], strides = [1, 1]} : vector<128x128xf32> to vector<128x64xf32>
    %23 = arith.negf %22 : vector<128x64xf32>
    %24 = math.exp %23 : vector<128x64xf32>
    %cst_4 = arith.constant 1.000000e+00 : f32
    %25 = vector.broadcast %cst_4 : f32 to vector<128x64xf32>
    %26 = arith.addf %25, %24 : vector<128x64xf32>
    %27 = arith.divf %25, %26 : vector<128x64xf32>
    %28 = vector.extract_strided_slice %27 {offsets = [0, 0], sizes = [128, 32], strides = [1, 1]} : vector<128x64xf32> to vector<128x32xf32>
    %29 = vector.extract_strided_slice %27 {offsets = [0, 32], sizes = [128, 32], strides = [1, 1]} : vector<128x64xf32> to vector<128x32xf32>
    %30 = vector.extract_strided_slice %20 {offsets = [0, 64], sizes = [128, 16], strides = [1, 1]} : vector<128x128xf32> to vector<128x16xf32>
    %31 = vector.extract_strided_slice %20 {offsets = [0, 80], sizes = [128, 32], strides = [1, 1]} : vector<128x128xf32> to vector<128x32xf32>
    %32 = arith.mulf %29, %21 : vector<128x32xf32>
    %c0_5 = arith.constant 0 : index
    %c0_6 = arith.constant 0 : index
    %33 = vector.load %arg5[%c0_5, %c0_6] : memref<32x32xf32, #tpu.memory_space<vmem>>, vector<32x32xf32>
    %cst_7 = arith.constant dense<0.000000e+00> : vector<128x32xf32>
    %34 = tpu.matmul %32, %33, %cst_7 {dimension_numbers = #tpu.dot_dimension_numbers<[1], [0], [0], [1], [0, 0, 1, 1], [], []>} : vector<128x32xf32>, vector<32x32xf32>, vector<128x32xf32> -> vector<128x32xf32>
    %35 = arith.addf %31, %34 : vector<128x32xf32>
    %36 = math.tanh %35 : vector<128x32xf32>
    %cst_8 = arith.constant 1.000000e+00 : f32
    %37 = vector.broadcast %cst_8 : f32 to vector<128x32xf32>
    %38 = arith.subf %37, %28 : vector<128x32xf32>
    %39 = arith.mulf %38, %21 : vector<128x32xf32>
    %40 = arith.mulf %28, %36 : vector<128x32xf32>
    %41 = arith.addf %39, %40 : vector<128x32xf32>
    %cst_9 = arith.constant 0.000000e+00 : f32
    %42 = vector.broadcast %cst_9 : f32 to vector<128x16xf32>
    %43 = arith.cmpf ogt, %30, %42 : vector<128x16xf32>
    %cst_10 = arith.constant 0.00999999977 : f32
    %44 = vector.broadcast %cst_10 : f32 to vector<128x16xf32>
    %45 = arith.mulf %44, %30 : vector<128x16xf32>
    %46 = arith.select %43, %30, %45 : vector<128x16xi1>, vector<128x16xf32>
    %c0_11 = arith.constant 0 : index
    %c0_12 = arith.constant 0 : index
    %47 = vector.load %arg6[%c0_11, %c0_12] : memref<1x16xf32, #tpu.memory_space<vmem>>, vector<1x16xf32>
    %48 = vector.broadcast %47 : vector<1x16xf32> to vector<128x16xf32>
    %49 = arith.mulf %46, %48 : vector<128x16xf32>
    %cst_13 = arith.constant dense<0.000000e+00> : vector<128xf32>
    %50 = vector.multi_reduction <add>, %49, %cst_13 [1] : vector<128x16xf32> to vector<128xf32>
    %51 = vector.shape_cast %50 : vector<128xf32> to vector<128x1xf32>
    %52 = math.exp %51 : vector<128x1xf32>
    %53 = vector.broadcast %52 : vector<128x1xf32> to vector<128x32xf32>
    %54 = arith.mulf %53, %41 : vector<128x32xf32>
    %cst_14 = arith.constant 0.000000e+00 : f32
    %55 = vector.broadcast %cst_14 : f32 to vector<128x95xf32>
    %56 = tpu.concatenate %54, %52, %55 in 1 : vector<128x32xf32>, vector<128x1xf32>, vector<128x95xf32> -> vector<128x128xf32>
    %57 = tpu.iota {dimensions = array<i32: 0>} : vector<16x128xi32>
    %c0_15 = arith.constant 0 : index
    %c0_16 = arith.constant 0 : index
    %58 = vector.load %arg3[%c0_15, %c0_16] : memref<1x128xi32, #tpu.memory_space<vmem>>, vector<1x128xi32>
    %59 = vector.broadcast %58 : vector<1x128xi32> to vector<16x128xi32>
    %60 = arith.cmpi eq, %57, %59 : vector<16x128xi32>
    %61 = arith.extui %60 : vector<16x128xi1> to vector<16x128xi32>
    %62 = arith.sitofp %61 : vector<16x128xi32> to vector<16x128xf32>
    %c0_17 = arith.constant 0 : index
    %c0_18 = arith.constant 0 : index
    %c0_19 = arith.constant 0 : index
    %63 = vector.load %arg7[%c0_17, %c0_18, %c0_19] : memref<1x16x128xf32, #tpu.memory_space<vmem>>, vector<1x16x128xf32>
    %cst_20 = arith.constant dense<0.000000e+00> : vector<16x128xf32>
    %64 = tpu.matmul %62, %56, %cst_20 {dimension_numbers = #tpu.dot_dimension_numbers<[1], [0], [0], [1], [0, 0, 1, 1], [], []>} : vector<16x128xf32>, vector<128x128xf32>, vector<16x128xf32> -> vector<16x128xf32>
    %65 = vector.shape_cast %64 : vector<16x128xf32> to vector<1x16x128xf32>
    %66 = arith.addf %63, %65 : vector<1x16x128xf32>
    %c0_21 = arith.constant 0 : index
    %c0_22 = arith.constant 0 : index
    %c0_23 = arith.constant 0 : index
    %67 = vector.load %arg7[%c0_21, %c0_22, %c0_23] : memref<1x16x128xf32, #tpu.memory_space<vmem>>, vector<1x16x128xf32>
    tpu.vector_store %arg7[%c0_21, %c0_22, %c0_23], %66 {strides = array<i32>} : memref<1x16x128xf32, #tpu.memory_space<vmem>>, vector<1x16x128xf32>,
    return
  }
  func.func @transform_0(%arg0: i32, %arg1: i32) -> (i32, i32) {
    %c1_i32 = arith.constant 1 : i32
    %0 = arith.muli %arg0, %c1_i32 : i32
    %1 = arith.addi %0, %arg1 : i32
    %c0_i32 = arith.constant 0 : i32
    %c0_i32_0 = arith.constant 0 : i32
    return %1, %c0_i32 : i32, i32
  }
  func.func @transform_1(%arg0: i32, %arg1: i32) -> (i32, i32) {
    %c1_i32 = arith.constant 1 : i32
    %0 = arith.muli %arg0, %c1_i32 : i32
    %1 = arith.addi %0, %arg1 : i32
    %c0_i32 = arith.constant 0 : i32
    %c0_i32_0 = arith.constant 0 : i32
    return %c0_i32, %1 : i32, i32
  }
  func.func @transform_2(%arg0: i32, %arg1: i32) -> (i32, i32) {
    %c0_i32 = arith.constant 0 : i32
    %c0_i32_0 = arith.constant 0 : i32
    %c0_i32_1 = arith.constant 0 : i32
    return %c0_i32, %c0_i32_0 : i32, i32
  }
  func.func @transform_3(%arg0: i32, %arg1: i32) -> (i32, i32) {
    %c0_i32 = arith.constant 0 : i32
    %c0_i32_0 = arith.constant 0 : i32
    %c0_i32_1 = arith.constant 0 : i32
    return %c0_i32, %c0_i32_0 : i32, i32
  }
  func.func @transform_4(%arg0: i32, %arg1: i32) -> (i32, i32) {
    %c0_i32 = arith.constant 0 : i32
    %c0_i32_0 = arith.constant 0 : i32
    %c0_i32_1 = arith.constant 0 : i32
    return %c0_i32, %c0_i32_0 : i32, i32
  }
  func.func @transform_5(%arg0: i32, %arg1: i32) -> (i32, i32, i32) {
    %c0_i32 = arith.constant 0 : i32
    %c0_i32_0 = arith.constant 0 : i32
    %c0_i32_1 = arith.constant 0 : i32
    return %arg0, %c0_i32, %c0_i32_0 : i32, i32, i32
  }
}

</mosaic_0001>

<bundles_post_ra>
// kernel: tpu_custom_call.1
= control target key start
LH: loop header
LB: loop body
LE: loop exit
PB: predicated region body
PF: predicated region fallthrough
CT: control target
= control target key end

     0   :  { %v2201_v1 = vmov 2   ;;  %v2202_v2 = vmov 1   ;;  %v2203_v8 = vmov 0   ;;  %s3363_s0 = inlined_call_operand.vmem [shape: s32[128,3], index: 0, kind: input, shape index: {}]   ;;  %s3364_s1 = inlined_call_operand.vmem [shape: s32[1,128], index: 1, kind: input, shape index: {}]   ;;  %s3365_s2 = inlined_call_operand.vmem [shape: f32[208,160], index: 2, kind: input, shape index: {}]   ;;  %s3366_s3 = inlined_call_operand.vmem [shape: f32[32,32], index: 3, kind: input, shape index: {}]   ;;  %s3367_s4 = inlined_call_operand.vmem [shape: f32[1,16], index: 4, kind: input, shape index: {}]   ;;  %s3368_s5 = inlined_call_operand.hbm [shape: f32[1,16,128], index: 5, kind: output, shape index: {}]  }
   0x1   :  { %v2247_v0 = vld [vmem:[%s3363_s0] sm:$0xff]  ;;  %2018 = vset.pattern.permute.xlu1 %v2201_v1  ;;  %2017 = vset.pattern.permute.xlu0 %v2202_v2  ;;  %v2256_v3 = vld [vmem:[%s3363_s0 + $0x18] sm:$0xff]  ;;  %v64_v4 = vld [vmem:[%s3363_s0 + $0x8] sm:$0xff] }
   0x2   :  { %275 = vperm.xlu1 %2018, %v2247_v0   ;;  %163 = vperm.xlu0 %2017, %v2247_v0   ;;  %v481_v5 = vld [vmem:[%s3365_s2 + $0xf8] sm:$0xff]  ;;  %v480_v6 = vld [vmem:[%s3365_s2 + $0xf0] sm:$0xff]  ;;  %v479_v7 = vld [vmem:[%s3365_s2 + $0xe8] sm:$0xff] }
   0x3   :  { %551 = vmatprep.subr.mxu0 %v481_v5  ;;  %1952 = vmatprep.subr.mxu1 %v481_v5  ;;  %v478_v9 = vld [vmem:[%s3365_s2 + $0xe0] sm:$0xff]  ;;  %v477_v11 = vld [vmem:[%s3365_s2 + $0xd8] sm:$0xff]  ;;  %v476_v12 = vld [vmem:[%s3365_s2 + $0xd0] sm:$0xff] }
   0x4   :  { %v2278_v10 = vld [vmem:[%s3363_s0 + $0x20] sm:$0xff]  ;;  %552 = vmatpush1.msra.mxu0 %v480_v6  ;;  %1978 = vmatpush1.msra.mxu1 %v480_v6  ;;  %v475_v13 = vld [vmem:[%s3365_s2 + $0xc8] sm:$0xff]  ;;  %v473_v15 = vld [vmem:[%s3365_s2 + $0xb8] sm:$0xff] }
   0x5   :  { %553 = vmatprep.subr.mxu0 %v479_v7  ;;  %1953 = vmatprep.subr.mxu1 %v479_v7  ;;  %v474_v14 = vld [vmem:[%s3365_s2 + $0xc0] sm:$0xff]  ;;  %v472_v16 = vld [vmem:[%s3365_s2 + $0xb0] sm:$0xff]  ;;  %v471_v17 = vld [vmem:[%s3365_s2 + $0xa8] sm:$0xff] }
   0x6   :  { %2019 = vset.pattern.permute.xlu1 %v2203_v8  ;;  %172 = vperm.xlu0 %2017, %v2256_v3   ;;  %v65_v18 = vld [vmem:[%s3363_s0 + $0x10] sm:$0xff]  ;;  %v470_v19 = vld [vmem:[%s3365_s2 + $0xa0] sm:$0xff]  ;;  %v469_v20 = vld [vmem:[%s3365_s2 + $0x98] sm:$0xff] }
   0x7   :  { %86 = vperm.xlu1 %2019, %v64_v4   ;;  %554 = vmatpush1.msra.mxu0 %v478_v9  ;;  %v468_v21 = vld [vmem:[%s3365_s2 + $0x90] sm:$0xff]  ;;  %v467_v22 = vld [vmem:[%s3365_s2 + $0x88] sm:$0xff]  ;;  %v2323_v23 = vld [vmem:[%s3365_s2 + $0x80] sm:$0xff] }
   0x8   :  { %555 = vmatprep.subr.mxu0 %v477_v11  ;;  %1979 = vmatpush1.msra.mxu1 %v478_v9 }
   0x9   :  { %556 = vmatpush1.msra.mxu0 %v476_v12  ;;  %1954 = vmatprep.subr.mxu1 %v477_v11 }
   0xa   :  { %175 = vperm.xlu0 %2017, %v2278_v10   ;;  %557 = vmatprep.subr.mxu0 %v475_v13 }
   0xb   :  { %2020 = vset.pattern.permute.xlu1 %v2202_v2  ;;  %558 = vmatpush1.msra.mxu0 %v474_v14 }
   0xc   :  { %166 = vperm.xlu1 %2020, %v64_v4   ;;  %559 = vmatprep.subr.mxu0 %v473_v15 }
   0xd   :  { %560 = vmatpush1.msra.mxu0 %v472_v16 }
   0xe   :  { %2026 = vset.pattern.permute.xlu0 %v2201_v1  ;;  %561 = vmatprep.subr.mxu0 %v471_v17 }
   0xf   :  { %278 = vperm.xlu0 %2026, %v64_v4   ;;  %562 = vmatpush1.msra.mxu0 %v470_v19 }
  0x10   :  { %2021 = vset.pattern.permute.xlu1 %v2203_v8  ;;  %563 = vmatprep.subr.mxu0 %v469_v20 }
  0x11   :  { %89 = vperm.xlu1 %2021, %v65_v18  }
  0x12   :  { %10 = vsyncpa [#allocation3], 0  ;;  %564 = vmatpush1.msra.mxu0 %v468_v21  ;;  %v2328_v24 = vld [vmem:[%s3365_s2 + $0x78] sm:$0xff]  ;;  %v2333_v25 = vld [vmem:[%s3363_s0 + $0x30] sm:$0xff]  ;;  %1980 = vmatpush1.msra.mxu1 %v476_v12  ;;  %vm502_vm14 = vcmask 654336   ;;  %s2208_s13 = smov 64  }
  0x13   :  { %281 = vperm.xlu0 %2026, %v65_v18   ;;  %565 = vmatprep.subr.mxu0 %v467_v22  ;;  %v2338_v26 = vld [vmem:[%s3365_s2 + $0x70] sm:$0xff]  ;;  %v2345_v27 = vld [vmem:[%s3365_s2 + $0x68] sm:$0xff]  ;;  %v2351_v28 = vld [vmem:[%s3365_s2 + $0x60] sm:$0xff]  ;;  %s2210_s14 = smov 48  }
  0x14   :  { %566 = vmatpush1.msra.mxu0 %v2323_v23  ;;  %v2358_v29 = vld [vmem:[%s3365_s2 + $0x58] sm:$0xff]  ;;  %1955 = vmatprep.subr.mxu1 %v475_v13  ;;  %v2370_v31 = vld [vmem:[%s3365_s2 + $0x50] sm:$0xff]  ;;  %v2377_v32 = vld [vmem:[%s3365_s2 + $0x48] sm:$0xff] }
  0x15   :  { %2022 = vset.pattern.permute.xlu1 %v2202_v2  ;;  %567 = vmatprep.subr.mxu0 %v2328_v24  ;;  %v2363_v30 = vld [vmem:[%s3363_s0 + $0x38] sm:$0xff]  ;;  %v2384_v33 = vld [vmem:[%s3365_s2 + $0x40] sm:$0xff]  ;;  %v2399_v35 = vld [vmem:[%s3365_s2 + $0x30] sm:$0xff] }
  0x16   :  { %169 = vperm.xlu1 %2022, %v65_v18   ;;  %568 = vmatpush1.msra.mxu0 %v2338_v26  ;;  %v2392_v34 = vld [vmem:[%s3365_s2 + $0x38] sm:$0xff]  ;;  %v2406_v36 = vld [vmem:[%s3365_s2 + $0x28] sm:$0xff]  ;;  %v2416_v38 = vld [vmem:[%s3365_s2 + $0x20] sm:$0xff] }
  0x17   :  { %293 = vperm.xlu0 %2026, %v2333_v25   ;;  %569 = vmatprep.subr.mxu0 %v2345_v27  ;;  %v68_v37 = vld [vmem:[%s3363_s0 + $0x28] sm:$0xff]  ;;  %v2422_v39 = vld [vmem:[%s3365_s2 + $0x18] sm:$0xff]  ;;  %v2428_v40 = vld [vmem:[%s3365_s2 + $0x10] sm:$0xff] }
  0x18   :  { %570 = vmatpush1.msra.mxu0 %v2351_v28  ;;  %1981 = vmatpush1.msra.mxu1 %v474_v14  ;;  %v2435_v41 = vld [vmem:[%s3365_s2 + $0x8] sm:$0xff]  ;;  %v2441_v42 = vld [vmem:[%s3365_s2] sm:$0xff]  ;;  %v2447_v43 = vld [vmem:[%s3365_s2 + $0x198] sm:$0xff] }
  0x19   :  { %571 = vmatprep.subr.mxu0 %v2358_v29  ;;  %1956 = vmatprep.subr.mxu1 %v473_v15  ;;  %v2455_v44 = vld [vmem:[%s3365_s2 + $0x190] sm:$0xff]  ;;  %v2467_v46 = vld [vmem:[%s3365_s2 + $0x188] sm:$0xff]  ;;  %v2474_v47 = vld [vmem:[%s3365_s2 + $0x180] sm:$0xff] }
  0x1a   :  { %2023 = vset.pattern.permute.xlu1 %v2203_v8  ;;  %572 = vmatpush1.msra.mxu0 %v2370_v31  ;;  %v2461_v45 = vld [vmem:[%s3363_s0 + $0x50] sm:$0xff]  ;;  %v2480_v48 = vld [vmem:[%s3365_s2 + $0x178] sm:$0xff]  ;;  %v2499_v51 = vld [vmem:[%s3365_s2 + $0x168] sm:$0xff] }
  0x1b   :  { %92 = vperm.xlu1 %2023, %v2256_v3   ;;  %296 = vperm.xlu0 %2026, %v2363_v30   ;;  %v2488_v49 = vld [vmem:[%s3365_s2 + $0x170] sm:$0xff]  ;;  %v2493_v50 = vld [vmem:[%s3363_s0 + $0x58] sm:$0xff]  ;;  %v2507_v52 = vld [vmem:[%s3365_s2 + $0x160] sm:$0xff] }
  0x1c   :  { %573 = vmatprep.subr.mxu0 %v2377_v32  ;;  %1982 = vmatpush1.msra.mxu1 %v472_v16  ;;  %v2513_v53 = vld [vmem:[%s3365_s2 + $0x158] sm:$0xff]  ;;  %v2520_v54 = vld [vmem:[%s3365_s2 + $0x150] sm:$0xff]  ;;  %v2525_v55 = vld [vmem:[%s3363_s0 + $0x68] sm:$0xff] }
  0x1d   :  { %574 = vmatpush1.msra.mxu0 %v2384_v33  ;;  %1957 = vmatprep.subr.mxu1 %v471_v17  ;;  %v2533_v56 = vld [vmem:[%s3365_s2 + $0x148] sm:$0xff]  ;;  %v2541_v57 = vld [vmem:[%s3365_s2 + $0x140] sm:$0xff]  ;;  %v2547_v58 = vld [vmem:[%s3365_s2 + $0x138] sm:$0xff]  ;;  %v3371_v17 = vlaneseq }
  0x1e   :  { %575 = vmatprep.subr.mxu0 %v2392_v34  ;;  %1983 = vmatpush1.msra.mxu1 %v470_v19  ;;  %v71_v59 = vld [vmem:[%s3363_s0 + $0x40] sm:$0xff]  ;;  %v488_v60 = vld [vmem:[%s3365_s2 + $0x130] sm:$0xff]  ;;  %v487_v61 = vld [vmem:[%s3365_s2 + $0x128] sm:$0xff] }
  0x1f   :  { %2024 = vset.pattern.permute.xlu1 %v2201_v1  ;;  %2033 = vset.pattern.permute.xlu0 %v2203_v8  ;;  %v486_v62 = vld [vmem:[%s3365_s2 + $0x120] sm:$0xff]  ;;  %v72_v63 = vld [vmem:[%s3363_s0 + $0x48] sm:$0xff]  ;;  %v78_v7 = vld [vmem:[%s3363_s0 + $0x78] sm:$0xff]  ;;  %v2647_v19 = vand.u32 127, %v3371_v17 }
  0x20   :  { %284 = vperm.xlu1 %2024, %v2256_v3   ;;  %83 = vperm.xlu0 %2033, %v2247_v0   ;;  %v485_v0 = vld [vmem:[%s3365_s2 + $0x118] sm:$0xff]  ;;  %v484_v3 = vld [vmem:[%s3365_s2 + $0x110] sm:$0xff]  ;;  %v483_v4 = vld [vmem:[%s3365_s2 + $0x108] sm:$0xff] }
  0x21   :  { %576 = vmatpush1.msra.mxu0 %v2399_v35  ;;  %1958 = vmatprep.subr.mxu1 %v469_v20  ;;  %v75_v5 = vld [vmem:[%s3363_s0 + $0x60] sm:$0xff]  ;;  %v77_v9 = vld [vmem:[%s3363_s0 + $0x70] sm:$0xff]  ;;  %s2206_s0 = smov 32  }
  0x22   :  { %577 = vmatprep.subr.mxu0 %v2406_v36  ;;  %1984 = vmatpush1.msra.mxu1 %v468_v21  ;;  %v482_v6 = vld [vmem:[%s3365_s2 + $0x100] sm:$0xff] }
  0x23   :  { %578 = vmatpush1.msra.mxu0 %v2416_v38  ;;  %1959 = vmatprep.subr.mxu1 %v467_v22  ;;  %v2652_v22 = vadd.s32 128, %v2647_v19 }
  0x24   :  { %2025 = vset.pattern.permute.xlu1 %v2203_v8  ;;  %98 = vperm.xlu0 %2033, %v68_v37  }
  0x25   :  { %95 = vperm.xlu1 %2025, %v2278_v10   ;;  %579 = vmatprep.subr.mxu0 %v2422_v39 }
  0x26   :  { %580 = vmatpush1.msra.mxu0 %v2428_v40  ;;  %1985 = vmatpush1.msra.mxu1 %v2323_v23 }
  0x27   :  { %581 = vmatprep.subr.mxu0 %v2435_v41  ;;  %1960 = vmatprep.subr.mxu1 %v2328_v24 }
  0x28   :  { %101 = vperm.xlu0 %2033, %v2333_v25   ;;  %582 = vmatpush1.msra.mxu0 %v2441_v42 }
  0x29   :  { %2027 = vset.pattern.permute.xlu1 %v2201_v1  ;;  %595 = vmatprep.subr.mxu0 %v2447_v43 }
  0x2a   :  { %287 = vperm.xlu1 %2027, %v2278_v10   ;;  %596 = vmatpush2.msra.mxu0 %v2455_v44 }
  0x2b   :  { %597 = vmatprep.subr.mxu0 %v2467_v46  ;;  %1986 = vmatpush1.msra.mxu1 %v2338_v26 }
  0x2c   :  { %113 = vperm.xlu0 %2033, %v2461_v45   ;;  %598 = vmatpush2.msra.mxu0 %v2474_v47 }
  0x2d   :  { %599 = vmatprep.subr.mxu0 %v2480_v48  ;;  %1961 = vmatprep.subr.mxu1 %v2345_v27  ;;  %v2204_v27 = vmov 0.0  }
  0x2e   :  { %2028 = vset.pattern.permute.xlu1 %v2202_v2  ;;  %600 = vmatpush2.msra.mxu0 %v2488_v49 }
  0x2f   :  { %178 = vperm.xlu1 %2028, %v68_v37   ;;  %601 = vmatprep.subr.mxu0 %v2499_v51 }
  0x30   :  { %116 = vperm.xlu0 %2033, %v2493_v50   ;;  %602 = vmatpush2.msra.mxu0 %v2507_v52 }
  0x31   :  { %603 = vmatprep.subr.mxu0 %v2513_v53  ;;  %1987 = vmatpush1.msra.mxu1 %v2351_v28 }
  0x32   :  { %604 = vmatpush2.msra.mxu0 %v2520_v54  ;;  %1962 = vmatprep.subr.mxu1 %v2358_v29 }
  0x33   :  { %2029 = vset.pattern.permute.xlu1 %v2201_v1  ;;  %605 = vmatprep.subr.mxu0 %v2533_v56 }
  0x34   :  { %290 = vperm.xlu1 %2029, %v68_v37   ;;  %122 = vperm.xlu0 %2033, %v2525_v55  }
  0x35   :  { %606 = vmatpush2.msra.mxu0 %v2541_v57  ;;  %1988 = vmatpush1.msra.mxu1 %v2370_v31 }
  0x36   :  { %607 = vmatprep.subr.mxu0 %v2547_v58  ;;  %1963 = vmatprep.subr.mxu1 %v2377_v32 }
  0x37   :  { %608 = vmatpush2.msra.mxu0 %v488_v60  ;;  %1989 = vmatpush1.msra.mxu1 %v2384_v33 }
  0x38   :  { %2030 = vset.pattern.permute.xlu1 %v2202_v2  ;;  %2041 = vset.pattern.permute.xlu0 %v2202_v2 }
  0x39   :  { %181 = vperm.xlu1 %2030, %v2333_v25   ;;  %187 = vperm.xlu0 %2041, %v71_v59  }
  0x3a   :  { %609 = vmatprep.subr.mxu0 %v487_v61  ;;  %1964 = vmatprep.subr.mxu1 %v2392_v34 }
  0x3b   :  { %610 = vmatpush2.msra.mxu0 %v486_v62  ;;  %1990 = vmatpush1.msra.mxu1 %v2399_v35 }
  0x3c   :  { %611 = vmatprep.subr.mxu0 %v485_v0  ;;  %1965 = vmatprep.subr.mxu1 %v2406_v36 }
  0x3d   :  { %2031 = vset.pattern.permute.xlu1 %v2203_v8  ;;  %190 = vperm.xlu0 %2041, %v72_v63  }
  0x3e   :  { %104 = vperm.xlu1 %2031, %v2363_v30   ;;  %612 = vmatpush2.msra.mxu0 %v484_v3 }
  0x3f   :  { %613 = vmatprep.subr.mxu0 %v483_v4  ;;  %1991 = vmatpush1.msra.mxu1 %v2416_v38 }
  0x40   :  { %614 = vmatpush2.msra.mxu0 %v482_v6  ;;  %1966 = vmatprep.subr.mxu1 %v2422_v39 }
  0x41   :  { %199 = vperm.xlu0 %2041, %v75_v5   ;;  %1992 = vmatpush1.msra.mxu1 %v2428_v40 }
  0x42   :  { %2032 = vset.pattern.permute.xlu1 %v2202_v2  ;;  %1967 = vmatprep.subr.mxu1 %v2435_v41 }
  0x43   :  { %184 = vperm.xlu1 %2032, %v2363_v30   ;;  %1993 = vmatpush1.msra.mxu1 %v2441_v42  ;;  %v3369_v30 = vmov 1.0  }
  0x44   :  { %1968 = vmatprep.subr.mxu1 %v2447_v43 }
  0x45   :  { %2044 = vset.pattern.permute.xlu0 %v2201_v1  ;;  %1994 = vmatpush2.msra.mxu1 %v2455_v44 }
  0x46   :  { %308 = vperm.xlu0 %2044, %v2493_v50   ;;  %1969 = vmatprep.subr.mxu1 %v2467_v46 }
  0x47   :  { %2034 = vset.pattern.permute.xlu1 %v2203_v8  ;;  %1995 = vmatpush2.msra.mxu1 %v2474_v47 }
  0x48   :  { %107 = vperm.xlu1 %2034, %v71_v59   ;;  %1970 = vmatprep.subr.mxu1 %v2480_v48 }
  0x49   :  { %1996 = vmatpush2.msra.mxu1 %v2488_v49 }
  0x4a   :  { %311 = vperm.xlu0 %2044, %v75_v5   ;;  %1971 = vmatprep.subr.mxu1 %v2499_v51 }
  0x4b   :  { %1997 = vmatpush2.msra.mxu1 %v2507_v52 }
  0x4c   :  { %2035 = vset.pattern.permute.xlu1 %v2201_v1  ;;  %1972 = vmatprep.subr.mxu1 %v2513_v53 }
  0x4d   :  { %299 = vperm.xlu1 %2035, %v71_v59   ;;  %1998 = vmatpush2.msra.mxu1 %v2520_v54 }
  0x4e   :  { %2048 = vset.pattern.permute.xlu0 %v2202_v2  ;;  %1973 = vmatprep.subr.mxu1 %v2533_v56 }
  0x4f   :  { %208 = vperm.xlu0 %2048, %v78_v7   ;;  %1999 = vmatpush2.msra.mxu1 %v2541_v57 }
  0x50   :  { %1974 = vmatprep.subr.mxu1 %v2547_v58 }
  0x51   :  { %2036 = vset.pattern.permute.xlu1 %v2203_v8  ;;  %2000 = vmatpush2.msra.mxu1 %v488_v60 }
  0x52   :  { %110 = vperm.xlu1 %2036, %v72_v63   ;;  %1975 = vmatprep.subr.mxu1 %v487_v61 }
  0x53   :  { %2050 = vset.pattern.permute.xlu0 %v2201_v1  ;;  %2001 = vmatpush2.msra.mxu1 %v486_v62 }
  0x54   :  { %1976 = vmatprep.subr.mxu1 %v485_v0 }
  0x55   :  { %2002 = vmatpush2.msra.mxu1 %v484_v3 }
  0x56   :  { %2037 = vset.pattern.permute.xlu1 %v2201_v1  ;;  %1977 = vmatprep.subr.mxu1 %v483_v4 }
  0x57   :  { %302 = vperm.xlu1 %2037, %v72_v63   ;;  %2003 = vmatpush2.msra.mxu1 %v482_v6 }
  0x5b   :  { %2038 = vset.pattern.permute.xlu1 %v2202_v2 }
  0x5c   :  { %193 = vperm.xlu1 %2038, %v2461_v45  }
  0x60   :  { %2039 = vset.pattern.permute.xlu1 %v2201_v1 }
  0x61   :  { %305 = vperm.xlu1 %2039, %v2461_v45  }
  0x65   :  { %2040 = vset.pattern.permute.xlu1 %v2202_v2 }
  0x66   :  { %196 = vperm.xlu1 %2040, %v2493_v50  }
  0x6a   :  { %202 = vperm.xlu1 %2040, %v2525_v55  }
  0x6e   :  { %2042 = vset.pattern.permute.xlu1 %v2201_v1 }
  0x6f   :  { %314 = vperm.xlu1 %2042, %v2525_v55  }
  0x73   :  { %2043 = vset.pattern.permute.xlu1 %v2203_v8 }
  0x74   :  { %119 = vperm.xlu1 %2043, %v75_v5  }
  0x78   :  { %125 = vperm.xlu1 %2043, %v77_v9  }
  0x7c   :  { %2045 = vset.pattern.permute.xlu1 %v2202_v2 }
  0x7d   :  { %205 = vperm.xlu1 %2045, %v77_v9   ;;  %v276_v10 = vpop.permute.xlu1 %275  ;;  %v164_v11 = vpop.permute.xlu0 %163 }
  0x7e   :  { %vm211_vm5 = vcmp.eq.s32.totalorder %v2652_v22, %v164_v11  ;;  %vm210_vm8 = vcmp.eq.s32.totalorder %v2647_v19, %v164_v11  ;;  %vm323_vm13 = vcmp.eq.s32.totalorder %v2652_v22, %v276_v10 }
  0x81   :  { %2046 = vset.pattern.permute.xlu1 %v2201_v1  ;;  %v2640_v12 = vpop.permute.xlu0 %172 }
  0x82   :  { %317 = vperm.xlu1 %2046, %v77_v9   ;;  %v87_v13 = vpop.permute.xlu1 %86 }
  0x83   :  { %vm133_vm2 = vcmp.eq.s32.totalorder %v2652_v22, %v87_v13 }
  0x85   :  { %v2642_v14 = vpop.permute.xlu0 %175 }
  0x86   :  { %2047 = vset.pattern.permute.xlu1 %v2203_v8 }
  0x87   :  { %128 = vperm.xlu1 %2047, %v78_v7   ;;  %v167_v15 = vpop.permute.xlu1 %166 }
  0x88   :  { %vm213_vm0 = vcmp.eq.s32.totalorder %v2652_v22, %v167_v15  ;;  %vm212_vm15 = vcmp.eq.s32.totalorder %v2647_v19, %v167_v15 }
  0x89   :  { %vm245_vm4 = vmor %vm133_vm2, %vm213_vm0 }
  0x8a   :  { %v279_v16 = vpop.permute.xlu0 %278 }
  0x8b   :  { %2049 = vset.pattern.permute.xlu1 %v2201_v1  ;;  %vm325_vm1 = vcmp.eq.s32.totalorder %v2652_v22, %v279_v16 }
  0x8c   :  { %320 = vperm.xlu1 %2049, %v78_v7   ;;  %v90_v2 = vpop.permute.xlu1 %89  ;;  %vm2664_vm7 = vmor %vm245_vm4, %vm325_vm1  ;;  %vm322_vm1 = vcmp.eq.s32.totalorder %v2647_v19, %v276_v10  ;;  %vm132_vm4 = vcmp.eq.s32.totalorder %v2647_v19, %v87_v13 }
  0x8d   :  { %vm135_vm6 = vcmp.eq.s32.totalorder %v2652_v22, %v90_v2  ;;  %v1732_v31 = vsel %vm2664_vm7, 1.0, %v2204_v27 }
  0x8e   :  { %v282_v18 = vpop.permute.xlu0 %281 }
  0x8f   :  { %vm327_vm2 = vcmp.eq.s32.totalorder %v2652_v22, %v282_v18 }
  0x91   :  { %v170_v20 = vpop.permute.xlu1 %169 }
  0x92   :  { %v2649_v21 = vpop.permute.xlu0 %293  ;;  %vm215_vm3 = vcmp.eq.s32.totalorder %v2652_v22, %v170_v20 }
  0x93   :  { %vm2669_vm9 = vmor %vm135_vm6, %vm215_vm3  ;;  %vm324_vm6 = vcmp.eq.s32.totalorder %v2647_v19, %v279_v16 }
  0x96   :  { %v2654_v23 = vpop.permute.xlu1 %92  ;;  %v2656_v8 = vpop.permute.xlu0 %296 }
  0x9b   :  { %v285_v1 = vpop.permute.xlu1 %284  ;;  %v84_v24 = vpop.permute.xlu0 %83 }
  0x9c   :  { %vm130_vm10 = vcmp.eq.s32.totalorder %v2647_v19, %v84_v24  ;;  %vm131_vm11 = vcmp.eq.s32.totalorder %v2652_v22, %v84_v24  ;;  %vm329_vm7 = vcmp.eq.s32.totalorder %v2652_v22, %v285_v1 }
  0x9d   :  { %vm243_vm12 = vmor %vm131_vm11, %vm211_vm5  ;;  %vm214_vm11 = vcmp.eq.s32.totalorder %v2647_v19, %v170_v20 }
  0x9e   :  { %vm355_vm0 = vmor %vm243_vm12, %vm323_vm13  ;;  %vm137_vm12 = vcmp.eq.s32.totalorder %v2652_v22, %v2654_v23 }
  0x9f   :  { %v1730_v28 = vsel %vm355_vm0, 1.0, %v2204_v27  ;;  %vm242_vm3 = vmor %vm130_vm10, %vm210_vm8  ;;  %vm217_vm10 = vcmp.eq.s32.totalorder %v2652_v22, %v2640_v12  ;;  %vm134_vm0 = vcmp.eq.s32.totalorder %v2647_v19, %v90_v2  ;;  %v99_v34 = vpop.permute.xlu0 %98 }
  0xa0   :  { %v96_v29 = vpop.permute.xlu1 %95  ;;  %1761 = vmatprep.mubr.msk.f32.mxu0 %vm502_vm14, %v1730_v28  ;;  %vm354_vm5 = vmor %vm242_vm3, %vm322_vm1  ;;  %vm326_vm3 = vcmp.eq.s32.totalorder %v2647_v19, %v282_v18 }
  0xa1   :  { %1762 = vmatmul.mubr.msk.f32.vlgmr.msra.gmra.mxu0 %vm354_vm5, %v3369_v30  ;;  %vm244_vm8 = vmor %vm132_vm4, %vm212_vm15  ;;  %vm219_vm5 = vcmp.eq.s32.totalorder %v2652_v22, %v2642_v14 }
  0xa2   :  { %1763 = vmatprep.mubr.msk.f32.mxu0 %vm502_vm14, %v1732_v31  ;;  %vm359_vm13 = vmor %vm2669_vm9, %vm327_vm2  ;;  %vm139_vm9 = vcmp.eq.s32.totalorder %v2652_v22, %v96_v29 }
  0xa3   :  { %vm356_vm15 = vmor %vm244_vm8, %vm324_vm6  ;;  %v1734_v33 = vsel %vm359_vm13, 1.0, %v2204_v27  ;;  %vm136_vm8 = vcmp.eq.s32.totalorder %v2647_v19, %v2654_v23  ;;  %v102_v37 = vpop.permute.xlu0 %101 }
  0xa4   :  { %vm246_vm1 = vmor %vm134_vm0, %vm214_vm11  ;;  %vm216_vm11 = vcmp.eq.s32.totalorder %v2647_v19, %v2640_v12 }
  0xa5   :  { %vm249_vm4 = vmor %vm137_vm12, %vm217_vm10  ;;  %v288_v32 = vpop.permute.xlu1 %287  ;;  %1764 = vmatmul.mubr.msk.f32.gmra.mxu0 %vm356_vm15, %v3369_v30  ;;  %vm328_vm12 = vcmp.eq.s32.totalorder %v2647_v19, %v285_v1  ;;  %vm138_vm15 = vcmp.eq.s32.totalorder %v2647_v19, %v96_v29 }
  0xa6   :  { %1765 = vmatprep.mubr.msk.f32.mxu0 %vm502_vm14, %v1734_v33  ;;  %vm361_vm2 = vmor %vm249_vm4, %vm329_vm7  ;;  %vm331_vm6 = vcmp.eq.s32.totalorder %v2652_v22, %v288_v32  ;;  %vm218_vm7 = vcmp.eq.s32.totalorder %v2647_v19, %v2642_v14 }
  0xa7   :  { %vm358_vm10 = vmor %vm246_vm1, %vm326_vm3  ;;  %v1736_v35 = vsel %vm361_vm2, 1.0, %v2204_v27  ;;  %vm330_vm1 = vcmp.eq.s32.totalorder %v2647_v19, %v288_v32  ;;  %v2733_v40 = vpop.permute.xlu0 %113 }
  0xa8   :  { %vm251_vm13 = vmor %vm139_vm9, %vm219_vm5  ;;  %vm141_vm9 = vcmp.eq.s32.totalorder %v2652_v22, %v99_v34 }
  0xa9   :  { %1766 = vmatmul.mubr.msk.f32.gmra.mxu0 %vm358_vm10, %v3369_v30  ;;  %vm363_vm0 = vmor %vm251_vm13, %vm331_vm6 }
  0xaa   :  { %v179_v36 = vpop.permute.xlu1 %178  ;;  %1767 = vmatprep.mubr.msk.f32.mxu0 %vm502_vm14, %v1736_v35  ;;  %vm248_vm4 = vmor %vm136_vm8, %vm216_vm11  ;;  %v1738_v38 = vsel %vm363_vm0, 1.0, %v2204_v27  ;;  %vm140_vm11 = vcmp.eq.s32.totalorder %v2647_v19, %v99_v34  ;;  %vm143_vm0 = vcmp.eq.s32.totalorder %v2652_v22, %v102_v37 }
  0xab   :  { %vm360_vm3 = vmor %vm248_vm4, %vm328_vm12  ;;  %vm221_vm5 = vcmp.eq.s32.totalorder %v2652_v22, %v179_v36  ;;  %vm220_vm10 = vcmp.eq.s32.totalorder %v2647_v19, %v179_v36  ;;  %v2746_v43 = vpop.permute.xlu0 %116 }
  0xac   :  { %vm250_vm2 = vmor %vm138_vm15, %vm218_vm7  ;;  %vm335_vm15 = vcmp.eq.s32.totalorder %v2652_v22, %v2649_v21 }
  0xad   :  { %1768 = vmatmul.mubr.msk.f32.gmra.mxu0 %vm360_vm3, %v3369_v30  ;;  %vm362_vm6 = vmor %vm250_vm2, %vm330_vm1  ;;  %vm142_vm3 = vcmp.eq.s32.totalorder %v2647_v19, %v102_v37  ;;  %vm334_vm2 = vcmp.eq.s32.totalorder %v2647_v19, %v2649_v21 }
  0xae   :  { %1769 = vmatprep.mubr.msk.f32.mxu0 %vm502_vm14, %v1738_v38  ;;  %vm253_vm8 = vmor %vm141_vm9, %vm221_vm5 }
  0xaf   :  { %v291_v39 = vpop.permute.xlu1 %290  ;;  %vm252_vm7 = vmor %vm140_vm11, %vm220_vm10  ;;  %v2751_v46 = vpop.permute.xlu0 %122 }
  0xb0   :  { %vm333_vm12 = vcmp.eq.s32.totalorder %v2652_v22, %v291_v39  ;;  %vm332_vm13 = vcmp.eq.s32.totalorder %v2647_v19, %v291_v39 }
  0xb1   :  { %1770 = vmatmul.mubr.msk.f32.gmra.mxu0 %vm362_vm6, %v3369_v30  ;;  %vm365_vm4 = vmor %vm253_vm8, %vm333_vm12 }
  0xb2   :  { %v1740_v41 = vsel %vm365_vm4, 1.0, %v2204_v27  ;;  %vm364_vm1 = vmor %vm252_vm7, %vm332_vm13 }
  0xb3   :  { %1771 = vmatprep.mubr.msk.f32.mxu0 %vm502_vm14, %v1740_v41 }
  0xb4   :  { %v182_v42 = vpop.permute.xlu1 %181  ;;  %v188_v50 = vpop.permute.xlu0 %187 }
  0xb5   :  { %vm222_vm5 = vcmp.eq.s32.totalorder %v2647_v19, %v182_v42  ;;  %vm223_vm9 = vcmp.eq.s32.totalorder %v2652_v22, %v182_v42  ;;  %1772 = vmatmul.mubr.msk.f32.gmra.mxu0 %vm364_vm1, %v3369_v30 }
  0xb6   :  { %vm255_vm6 = vmor %vm143_vm0, %vm223_vm9  ;;  %vm337_vm0 = vcmp.eq.s32.totalorder %v2652_v22, %v2656_v8 }
  0xb7   :  { %vm367_vm8 = vmor %vm255_vm6, %vm335_vm15  ;;  %vm227_vm6 = vcmp.eq.s32.totalorder %v2652_v22, %v188_v50 }
  0xb8   :  { %v1742_v44 = vsel %vm367_vm8, 1.0, %v2204_v27  ;;  %vm254_vm10 = vmor %vm142_vm3, %vm222_vm5  ;;  %vm336_vm3 = vcmp.eq.s32.totalorder %v2647_v19, %v2656_v8  ;;  %v191_v54 = vpop.permute.xlu0 %190 }
  0xb9   :  { %v105_v45 = vpop.permute.xlu1 %104  ;;  %1773 = vmatprep.mubr.msk.f32.mxu0 %vm502_vm14, %v1742_v44  ;;  %vm366_vm11 = vmor %vm254_vm10, %vm334_vm2  ;;  %vm226_vm10 = vcmp.eq.s32.totalorder %v2647_v19, %v188_v50 }
  0xba   :  { %1774 = vmatmul.mubr.msk.f32.gmra.mxu0 %vm366_vm11, %v3369_v30  ;;  %vm145_vm12 = vcmp.eq.s32.totalorder %v2652_v22, %v105_v45  ;;  %vm144_vm15 = vcmp.eq.s32.totalorder %v2647_v19, %v105_v45 }
  0xbc   :  { %v200_v58 = vpop.permute.xlu0 %199 }
  0xbe   :  { %v185_v47 = vpop.permute.xlu1 %184 }
  0xbf   :  { %vm224_vm13 = vcmp.eq.s32.totalorder %v2647_v19, %v185_v47  ;;  %vm225_vm4 = vcmp.eq.s32.totalorder %v2652_v22, %v185_v47 }
  0xc0   :  { %vm257_vm7 = vmor %vm145_vm12, %vm225_vm4 }
  0xc1   :  { %vm369_vm1 = vmor %vm257_vm7, %vm337_vm0  ;;  %v309_v60 = vpop.permute.xlu0 %308 }
  0xc2   :  { %v1744_v48 = vsel %vm369_vm1, 1.0, %v2204_v27  ;;  %vm256_vm5 = vmor %vm144_vm15, %vm224_vm13  ;;  %vm229_vm1 = vcmp.eq.s32.totalorder %v2652_v22, %v191_v54 }
  0xc3   :  { %v108_v49 = vpop.permute.xlu1 %107  ;;  %1775 = vmatprep.mubr.msk.f32.mxu0 %vm502_vm14, %v1744_v48  ;;  %vm368_vm9 = vmor %vm256_vm5, %vm336_vm3  ;;  %vm228_vm5 = vcmp.eq.s32.totalorder %v2647_v19, %v191_v54  ;;  %v890_v54 = vld [vmem:[%s3366_s3 + $0x10] sm:$0xff] }
  0xc4   :  { %1776 = vmatmul.mubr.msk.f32.gmra.mxu0 %vm368_vm9, %v3369_v30  ;;  %vm147_vm2 = vcmp.eq.s32.totalorder %v2652_v22, %v108_v49  ;;  %vm146_vm8 = vcmp.eq.s32.totalorder %v2647_v19, %v108_v49 }
  0xc5   :  { %vm259_vm11 = vmor %vm147_vm2, %vm227_vm6  ;;  %v312_v4 = vpop.permute.xlu0 %311 }
  0xc6   :  { %vm258_vm0 = vmor %vm146_vm8, %vm226_vm10 }
  0xc8   :  { %v300_v51 = vpop.permute.xlu1 %299 }
  0xc9   :  { %vm338_vm12 = vcmp.eq.s32.totalorder %v2647_v19, %v300_v51  ;;  %vm339_vm13 = vcmp.eq.s32.totalorder %v2652_v22, %v300_v51 }
  0xca   :  { %vm371_vm4 = vmor %vm259_vm11, %vm339_vm13  ;;  %vm151_vm13 = vcmp.eq.s32.totalorder %v2652_v22, %v2733_v40  ;;  %v209_v14 = vpop.permute.xlu0 %208 }
  0xcb   :  { %v1746_v52 = vsel %vm371_vm4, 1.0, %v2204_v27  ;;  %vm370_vm7 = vmor %vm258_vm0, %vm338_vm12 }
  0xcc   :  { %1777 = vmatprep.mubr.msk.f32.mxu0 %vm502_vm14, %v1746_v52 }
  0xcd   :  { %v111_v53 = vpop.permute.xlu1 %110  ;;  %1778 = vmatmul.mubr.msk.f32.gmra.mxu0 %vm370_vm7, %v3369_v30 }
  0xce   :  { %vm149_vm15 = vcmp.eq.s32.totalorder %v2652_v22, %v111_v53  ;;  %vm148_vm3 = vcmp.eq.s32.totalorder %v2647_v19, %v111_v53  ;;  %v891_v53 = vld [vmem:[%s3366_s3 + $0x18] sm:$0xff] }
  0xcf   :  { %vm261_vm9 = vmor %vm149_vm15, %vm229_vm1  ;;  %vm150_vm1 = vcmp.eq.s32.totalorder %v2647_v19, %v2733_v40  ;;  %1885 = vmatprep.subr.mxu1 %v891_v53 }
  0xd0   :  { %vm260_vm10 = vmor %vm148_vm3, %vm228_vm5 }
  0xd2   :  { %v303_v55 = vpop.permute.xlu1 %302 }
  0xd3   :  { %vm340_vm2 = vcmp.eq.s32.totalorder %v2647_v19, %v303_v55  ;;  %vm341_vm6 = vcmp.eq.s32.totalorder %v2652_v22, %v303_v55 }
  0xd4   :  { %vm373_vm8 = vmor %vm261_vm9, %vm341_vm6  ;;  %vm153_vm6 = vcmp.eq.s32.totalorder %v2652_v22, %v2746_v43 }
  0xd5   :  { %v1748_v56 = vsel %vm373_vm8, 1.0, %v2204_v27  ;;  %vm372_vm11 = vmor %vm260_vm10, %vm340_vm2  ;;  %vm345_vm2 = vcmp.eq.s32.totalorder %v2652_v22, %v309_v60 }
  0xd6   :  { %1779 = vmatprep.mubr.msk.f32.mxu0 %vm502_vm14, %v1748_v56 }
  0xd7   :  { %v194_v57 = vpop.permute.xlu1 %193  ;;  %1780 = vmatmul.mubr.msk.f32.gmra.mxu0 %vm372_vm11, %v3369_v30 }
  0xd8   :  { %vm231_vm12 = vcmp.eq.s32.totalorder %v2652_v22, %v194_v57  ;;  %vm230_vm4 = vcmp.eq.s32.totalorder %v2647_v19, %v194_v57 }
  0xd9   :  { %vm263_vm0 = vmor %vm151_vm13, %vm231_vm12  ;;  %vm344_vm12 = vcmp.eq.s32.totalorder %v2647_v19, %v309_v60  ;;  %vm152_vm13 = vcmp.eq.s32.totalorder %v2647_v19, %v2746_v43  ;;  %v889_v60 = vld [vmem:[%s3366_s3 + $0x8] sm:$0xff] }
  0xda   :  { %vm262_vm5 = vmor %vm150_vm1, %vm230_vm4 }
  0xdc   :  { %v306_v59 = vpop.permute.xlu1 %305 }
  0xdd   :  { %vm342_vm7 = vcmp.eq.s32.totalorder %v2647_v19, %v306_v59  ;;  %vm343_vm15 = vcmp.eq.s32.totalorder %v2652_v22, %v306_v59 }
  0xde   :  { %vm375_vm3 = vmor %vm263_vm0, %vm343_vm15 }
  0xdf   :  { %v1750_v61 = vsel %vm375_vm3, 1.0, %v2204_v27  ;;  %vm374_vm9 = vmor %vm262_vm5, %vm342_vm7  ;;  %vm157_vm3 = vcmp.eq.s32.totalorder %v2652_v22, %v2751_v46 }
  0xe0   :  { %1781 = vmatprep.mubr.msk.f32.mxu0 %vm502_vm14, %v1750_v61 }
  0xe1   :  { %v197_v62 = vpop.permute.xlu1 %196  ;;  %1782 = vmatmul.mubr.msk.f32.gmra.mxu0 %vm374_vm9, %v3369_v30 }
  0xe2   :  { %vm232_vm8 = vcmp.eq.s32.totalorder %v2647_v19, %v197_v62  ;;  %vm233_vm10 = vcmp.eq.s32.totalorder %v2652_v22, %v197_v62  ;;  %v888_v62 = vld [vmem:[%s3366_s3] sm:$0xff]  ;;  %s2207_s3 = smov 96  }
  0xe3   :  { %vm265_vm11 = vmor %vm153_vm6, %vm233_vm10  ;;  %vm156_vm6 = vcmp.eq.s32.totalorder %v2647_v19, %v2751_v46 }
  0xe4   :  { %vm377_vm4 = vmor %vm265_vm11, %vm345_vm2 }
  0xe5   :  { %v203_v63 = vpop.permute.xlu1 %202  ;;  %v1752_v0 = vsel %vm377_vm4, 1.0, %v2204_v27  ;;  %vm264_vm0 = vmor %vm152_vm13, %vm232_vm8  ;;  %vm235_vm13 = vcmp.eq.s32.totalorder %v2652_v22, %v200_v58 }
  0xe6   :  { %1783 = vmatprep.mubr.msk.f32.mxu0 %vm502_vm14, %v1752_v0  ;;  %vm376_vm7 = vmor %vm264_vm0, %vm344_vm12  ;;  %vm237_vm15 = vcmp.eq.s32.totalorder %v2652_v22, %v203_v63  ;;  %vm236_vm1 = vcmp.eq.s32.totalorder %v2647_v19, %v203_v63  ;;  %vm347_vm12 = vcmp.eq.s32.totalorder %v2652_v22, %v312_v4 }
  0xe7   :  { %1784 = vmatmul.mubr.msk.f32.gmra.mxu0 %vm376_vm7, %v3369_v30  ;;  %vm269_vm9 = vmor %vm157_vm3, %vm237_vm15  ;;  %vm346_vm15 = vcmp.eq.s32.totalorder %v2647_v19, %v312_v4  ;;  %vm234_vm3 = vcmp.eq.s32.totalorder %v2647_v19, %v200_v58 }
  0xe8   :  { %vm268_vm10 = vmor %vm156_vm6, %vm236_vm1 }
  0xea   :  { %v315_v3 = vpop.permute.xlu1 %314 }
  0xeb   :  { %vm348_vm5 = vcmp.eq.s32.totalorder %v2647_v19, %v315_v3  ;;  %vm349_vm2 = vcmp.eq.s32.totalorder %v2652_v22, %v315_v3 }
  0xec   :  { %vm381_vm8 = vmor %vm269_vm9, %vm349_vm2 }
  0xed   :  { %v1756_v5 = vsel %vm381_vm8, 1.0, %v2204_v27  ;;  %vm380_vm11 = vmor %vm268_vm10, %vm348_vm5 }
  0xee   :  { %1787 = vmatprep.mubr.msk.f32.mxu1 %vm502_vm14, %v1756_v5 }
  0xef   :  { %v120_v6 = vpop.permute.xlu1 %119  ;;  %1788 = vmatmul.mubr.msk.f32.vlgmr.msra.gmra.mxu1 %vm380_vm11, %v3369_v30 }
  0xf0   :  { %vm154_vm4 = vcmp.eq.s32.totalorder %v2647_v19, %v120_v6  ;;  %vm155_vm0 = vcmp.eq.s32.totalorder %v2652_v22, %v120_v6  ;;  %1886 = vmatpush3.msra.mxu1 %v891_v53 }
  0xf1   :  { %vm267_vm7 = vmor %vm155_vm0, %vm235_vm13  ;;  %1887 = vmatprep.subr.mxu1 %v890_v54 }
  0xf2   :  { %vm379_vm1 = vmor %vm267_vm7, %vm347_vm12  ;;  %1888 = vmatpush3.msra.mxu1 %v890_v54 }
  0xf3   :  { %v126_v7 = vpop.permute.xlu1 %125  ;;  %v1754_v9 = vsel %vm379_vm1, 1.0, %v2204_v27  ;;  %vm266_vm5 = vmor %vm154_vm4, %vm234_vm3  ;;  %vm241_vm3 = vcmp.eq.s32.totalorder %v2652_v22, %v209_v14  ;;  %1889 = vmatprep.subr.mxu1 %v889_v60 }
  0xf4   :  { %1785 = vmatprep.mubr.msk.f32.mxu0 %vm502_vm14, %v1754_v9  ;;  %vm378_vm9 = vmor %vm266_vm5, %vm346_vm15  ;;  %vm159_vm6 = vcmp.eq.s32.totalorder %v2652_v22, %v126_v7  ;;  %vm158_vm13 = vcmp.eq.s32.totalorder %v2647_v19, %v126_v7  ;;  %vm240_vm5 = vcmp.eq.s32.totalorder %v2647_v19, %v209_v14  ;;  %1890 = vmatpush3.msra.mxu1 %v889_v60 }
  0xf5   :  { %1786 = vmatmul.mubr.msk.f32.gmra.mxu0 %vm378_vm9, %v3369_v30  ;;  %1891 = vmatprep.subr.mxu1 %v888_v62 }
  0xf6   :  { %1892 = vmatpush3.msra.mxu1 %v888_v62 }
  0xf8   :  { %v206_v10 = vpop.permute.xlu1 %205 }
  0xf9   :  { %vm239_vm2 = vcmp.eq.s32.totalorder %v2652_v22, %v206_v10  ;;  %vm238_vm8 = vcmp.eq.s32.totalorder %v2647_v19, %v206_v10 }
  0xfa   :  { %vm271_vm10 = vmor %vm159_vm6, %vm239_vm2 }
  0xfb   :  { %vm270_vm0 = vmor %vm158_vm13, %vm238_vm8 }
  0xfd   :  { %v318_v11 = vpop.permute.xlu1 %317 }
  0xfe   :  { %vm350_vm11 = vcmp.eq.s32.totalorder %v2647_v19, %v318_v11  ;;  %vm351_vm12 = vcmp.eq.s32.totalorder %v2652_v22, %v318_v11 }
  0xff   :  { %vm383_vm4 = vmor %vm271_vm10, %vm351_vm12 }
 0x100   :  { %v1758_v12 = vsel %vm383_vm4, 1.0, %v2204_v27  ;;  %vm382_vm7 = vmor %vm270_vm0, %vm350_vm11 }
 0x101   :  { %1789 = vmatprep.mubr.msk.f32.mxu1 %vm502_vm14, %v1758_v12 }
 0x102   :  { %v129_v13 = vpop.permute.xlu1 %128  ;;  %1790 = vmatmul.mubr.msk.f32.gmra.mxu1 %vm382_vm7, %v3369_v30 }
 0x103   :  { %vm161_vm15 = vcmp.eq.s32.totalorder %v2652_v22, %v129_v13  ;;  %vm160_vm1 = vcmp.eq.s32.totalorder %v2647_v19, %v129_v13 }
 0x104   :  { %vm273_vm9 = vmor %vm161_vm15, %vm241_vm3 }
 0x105   :  { %vm272_vm10 = vmor %vm160_vm1, %vm240_vm5 }
 0x107   :  { %v321_v15 = vpop.permute.xlu1 %320 }
 0x108   :  { %vm352_vm2 = vcmp.eq.s32.totalorder %v2647_v19, %v321_v15  ;;  %vm353_vm6 = vcmp.eq.s32.totalorder %v2652_v22, %v321_v15 }
 0x109   :  { %vm385_vm8 = vmor %vm273_vm9, %vm353_vm6 }
 0x10a   :  { %v1760_v16 = vsel %vm385_vm8, 1.0, %v2204_v27  ;;  %vm384_vm11 = vmor %vm272_vm10, %vm352_vm2 }
 0x10b   :  { %1791 = vmatprep.mubr.msk.f32.mxu1 %vm502_vm14, %v1760_v16  ;;  %vm940_vm14 = vcmask 261120  }
 0x10c   :  { %1792 = vmatmul.mubr.msk.f32.gmra.mxu1 %vm384_vm11, %v3369_v30 }
 0x161   :  { %v2842_v2 = vpop.f32.mrf.mxu0 }
 0x162   :  { %v1793_v41 = vmul.f32 -1.442695, %v2842_v2 }
 0x163   :  { %v2844_v18 = vpop.f32.mrf.mxu0 }
 0x164   :  { %3384 = vst [vmem:[#allocation5_spill] sm:$0xff] %v2844_v18  ;;  %824 = vrot.lane.b32.xlu1 %v2844_v18, %s2206_s0  ;;  %2051 = vpow2.f32 %v1793_v41 }
 0x165   :  { %v2848_v19 = vpop.f32.mrf.mxu0 }
 0x166   :  { %v1794_v43 = vmul.f32 -1.442695, %v2848_v19  ;;  %vm1343_vm11 = vcmp.gt.f32.partialorder %v2848_v19, 0.0 }
 0x167   :  { %v2850_v20 = vpop.f32.mrf.mxu0 }
 0x168   :  { %3385 = vst [vmem:[#allocation6_spill] sm:$0xff] %v2850_v20  ;;  %826 = vrot.lane.b32.xlu0 %v2850_v20, %s2206_s0  ;;  %2053 = vpow2.f32 %v1794_v43 }
 0x169   :  { %v2854_v21 = vpop.f32.mrf.mxu0 }
 0x16a   :  { %v1795_v46 = vmul.f32 -1.442695, %v2854_v21  ;;  %vm1344_vm10 = vcmp.gt.f32.partialorder %v2854_v21, 0.0 }
 0x16b   :  { %v2856_v22 = vpop.f32.mrf.mxu0 }
 0x16c   :  { %828 = vrot.lane.b32.xlu1 %v2856_v22, %s2206_s0  ;;  %2055 = vpow2.f32 %v1795_v46 }
 0x16d   :  { %v2860_v23 = vpop.f32.mrf.mxu0 }
 0x16e   :  { %v1796_v47 = vmul.f32 -1.442695, %v2860_v23  ;;  %vm1345_vm8 = vcmp.gt.f32.partialorder %v2860_v23, 0.0 }
 0x16f   :  { %v2862_v8 = vpop.f32.mrf.mxu0 }
 0x170   :  { %3386 = vst [vmem:[#allocation7_spill] sm:$0xff] %v2862_v8  ;;  %830 = vrot.lane.b32.xlu0 %v2862_v8, %s2206_s0  ;;  %2057 = vpow2.f32 %v1796_v47 }
 0x171   :  { %v2866_v1 = vpop.f32.mrf.mxu0  ;;  %v2052_v48 = vpop.eup %2051 }
 0x172   :  { %v1797_v49 = vmul.f32 -1.442695, %v2866_v1  ;;  %v760_v51 = vadd.f32 1.0, %v2052_v48  ;;  %vm1346_vm6 = vcmp.gt.f32.partialorder %v2866_v1, 0.0 }
 0x173   :  { %v2868_v24 = vpop.f32.mrf.mxu0 }
 0x174   :  { %832 = vrot.lane.b32.xlu1 %v2868_v24, %s2206_s0  ;;  %2059 = vpow2.f32 %v1797_v49 }
 0x175   :  { %v2872_v25 = vpop.f32.mrf.mxu0  ;;  %v2054_v56 = vpop.eup %2053  ;;  %2061 = vrcp.f32 %v760_v51 }
 0x176   :  { %v1798_v55 = vmul.f32 -1.442695, %v2872_v25  ;;  %v761_v57 = vadd.f32 1.0, %v2054_v56  ;;  %vm1347_vm2 = vcmp.gt.f32.partialorder %v2872_v25, 0.0 }
 0x177   :  { %v2874_v26 = vpop.f32.mrf.mxu0 }
 0x178   :  { %3387 = vst [vmem:[#allocation8_spill] sm:$0xff] %v2874_v26  ;;  %834 = vrot.lane.b32.xlu0 %v2874_v26, %s2206_s0  ;;  %2063 = vpow2.f32 %v1798_v55 }
 0x179   :  { %v2056_v58 = vpop.eup %2055  ;;  %2065 = vrcp.f32 %v761_v57 }
 0x17a   :  { %v2878_v27 = vpop.f32.mrf.mxu0  ;;  %v762_v63 = vadd.f32 1.0, %v2056_v58 }
 0x17b   :  { %v1799_v59 = vmul.f32 -1.442695, %v2878_v27  ;;  %vm1348_vm9 = vcmp.gt.f32.partialorder %v2878_v27, 0.0 }
 0x17c   :  { %v2880_v28 = vpop.f32.mrf.mxu0 }
 0x17d   :  { %836 = vrot.lane.b32.xlu1 %v2880_v28, %s2206_s0  ;;  %v2058_v0 = vpop.eup %2057  ;;  %2067 = vpow2.f32 %v1799_v59 }
 0x17e   :  { %2069 = vrcp.f32 %v762_v63  ;;  %v763_v4 = vadd.f32 1.0, %v2058_v0 }
 0x180   :  { %2071 = vrcp.f32 %v763_v4 }
 0x181   :  { %v2060_v5 = vpop.eup %2059 }
 0x182   :  { %v2958_v7 = vpop.eup %2061  ;;  %v764_v9 = vadd.f32 1.0, %v2060_v5 }
 0x183   :  { %3388 = vst [vmem:[#allocation9_spill] sm:$0xff] %v2958_v7 }
 0x184   :  { %v2884_v29 = vpop.f32.mrf.mxu0 }
 0x185   :  { %v1800_v6 = vmul.f32 -1.442695, %v2884_v29  ;;  %v2064_v10 = vpop.eup %2063  ;;  %vm1349_vm5 = vcmp.gt.f32.partialorder %v2884_v29, 0.0 }
 0x186   :  { %v2886_v31 = vpop.f32.mrf.mxu0  ;;  %v765_v13 = vadd.f32 1.0, %v2064_v10  ;;  %v2962_v14 = vpop.eup %2065 }
 0x187   :  { %838 = vrot.lane.b32.xlu0 %v2886_v31, %s2206_s0  ;;  %2073 = vpow2.f32 %v1800_v6  ;;  %3389 = vst [vmem:[#allocation10_spill] sm:$0xff] %v2962_v14 }
 0x188   :  { %2075 = vrcp.f32 %v764_v9 }
 0x189   :  { %2077 = vrcp.f32 %v765_v13 }
 0x18a   :  { %v2068_v16 = vpop.eup %2067 }
 0x18b   :  { %v2967_v46 = vpop.eup %2069  ;;  %v766_v47 = vadd.f32 1.0, %v2068_v16 }
 0x18d   :  { %v2890_v32 = vpop.f32.mrf.mxu0  ;;  %v2971_v51 = vpop.eup %2071 }
 0x18e   :  { %v1801_v43 = vmul.f32 -1.442695, %v2890_v32  ;;  %vm1350_vm1 = vcmp.gt.f32.partialorder %v2890_v32, 0.0 }
 0x18f   :  { %v2892_v33 = vpop.f32.mrf.mxu0 }
 0x190   :  { %840 = vrot.lane.b32.xlu1 %v2892_v33, %s2206_s0  ;;  %2079 = vpow2.f32 %v1801_v43 }
 0x191   :  { %2081 = vrcp.f32 %v766_v47 }
 0x194   :  { %v2074_v55 = vpop.eup %2073 }
 0x195   :  { %v2975_v56 = vpop.eup %2075  ;;  %v767_v60 = vadd.f32 1.0, %v2074_v55 }
 0x196   :  { %v2980_v62 = vpop.eup %2077 }
 0x197   :  { %v2896_v34 = vpop.f32.mrf.mxu0 }
 0x198   :  { %v1802_v58 = vmul.f32 -1.442695, %v2896_v34  ;;  %vm1351_vm3 = vcmp.gt.f32.partialorder %v2896_v34, 0.0 }
 0x199   :  { %v2898_v35 = vpop.f32.mrf.mxu0 }
 0x19a   :  { %842 = vrot.lane.b32.xlu0 %v2898_v35, %s2206_s0  ;;  %2083 = vpow2.f32 %v1802_v58 }
 0x19b   :  { %2085 = vrcp.f32 %v767_v60 }
 0x19d   :  { %v2080_v4 = vpop.eup %2079 }
 0x19e   :  { %v2984_v5 = vpop.eup %2081 }
 0x1a1   :  { %v2902_v36 = vpop.f32.mrf.mxu0 }
 0x1a2   :  { %v1803_v9 = vmul.f32 -1.442695, %v2902_v36  ;;  %vm1352_vm15 = vcmp.gt.f32.partialorder %v2902_v36, 0.0 }
 0x1a3   :  { %v2904_v37 = vpop.f32.mrf.mxu0 }
 0x1a4   :  { %844 = vrot.lane.b32.xlu1 %v2904_v37, %s2206_s0  ;;  %2087 = vpow2.f32 %v1803_v9 }
 0x1a7   :  { %v2908_v38 = vpop.f32.mrf.mxu0  ;;  %v2084_v13 = vpop.eup %2083 }
 0x1a8   :  { %v769_v43 = vadd.f32 1.0, %v2084_v13  ;;  %vm1353_vm7 = vcmp.gt.f32.partialorder %v2908_v38, 0.0 }
 0x1a9   :  { %v2910_v39 = vpop.f32.mrf.mxu0 }
 0x1aa   :  { %846 = vrot.lane.b32.xlu0 %v2910_v39, %s2206_s0 }
 0x1af   :  { %v2914_v40 = vpop.f32.mrf.mxu1 }
 0x1b0   :  { %v1806_v47 = vmul.f32 -1.442695, %v2914_v40  ;;  %vm1355_vm4 = vcmp.gt.f32.partialorder %v2914_v40, 0.0 }
 0x1b1   :  { %v2917_v42 = vpop.f32.mrf.mxu1 }
 0x1b2   :  { %850 = vrot.lane.b32.xlu0 %v2917_v42, %s2206_s0 }
 0x1b5   :  { %v2922_v44 = vpop.f32.mrf.mxu0 }
 0x1b6   :  { %vm1354_vm0 = vcmp.gt.f32.partialorder %v2922_v44, 0.0 }
 0x1b7   :  { %v2924_v45 = vpop.f32.mrf.mxu0 }
 0x1b8   :  { %848 = vrot.lane.b32.xlu1 %v2924_v45, %s2206_s0 }
 0x1c2   :  { %v2931_v50 = vpop.f32.mrf.mxu1 }
 0x1c3   :  { %vm1356_vm13 = vcmp.gt.f32.partialorder %v2931_v50, 0.0 }
 0x1c4   :  { %v2933_v52 = vpop.f32.mrf.mxu1 }
 0x1c5   :  { %852 = vrot.lane.b32.xlu1 %v2933_v52, %s2206_s0 }
 0x1cc   :  { %v2948_v61 = vpop.f32.mrf.mxu1 }
 0x1cd   :  { %vm1357_vm12 = vcmp.gt.f32.partialorder %v2948_v61, 0.0 }
 0x1ce   :  { %v2953_v3 = vpop.f32.mrf.mxu1 }
 0x1cf   :  { %854 = vrot.lane.b32.xlu0 %v2953_v3, %s2206_s0 }
 0x1d6   :  { %v825_v11 = vpop.permute.xlu1 %824 }
 0x1d7   :  { %v872_v12 = vmul.f32 %v2958_v7, %v825_v11  ;;  %v768_v11 = vadd.f32 1.0, %v2080_v4 }
 0x1d9   :  { %908 = vrot.lane.b32.xlu1 %v872_v12, %s2207_s3  ;;  %2089 = vrcp.f32 %v768_v11  ;;  %v1804_v12 = vmul.f32 -1.442695, %v2908_v38 }
 0x1da   :  { %v827_v15 = vpop.permute.xlu0 %826 }
 0x1db   :  { %v873_v41 = vmul.f32 %v2962_v14, %v827_v15  ;;  %v2990_v15 = vpop.eup %2085  ;;  %2091 = vpow2.f32 %v1804_v12 }
 0x1dc   :  { %2093 = vrcp.f32 %v769_v43  ;;  %v1808_v43 = vmul.f32 -1.442695, %v2948_v61 }
 0x1dd   :  { %910 = vrot.lane.b32.xlu0 %v873_v41, %s2207_s3  ;;  %2095 = vpow2.f32 %v1806_v47 }
 0x1de   :  { %v829_v48 = vpop.permute.xlu1 %828 }
 0x1df   :  { %v874_v49 = vmul.f32 %v2967_v46, %v829_v48  ;;  %v2088_v48 = vpop.eup %2087 }
 0x1e0   :  { %v770_v55 = vadd.f32 1.0, %v2088_v48 }
 0x1e1   :  { %912 = vrot.lane.b32.xlu1 %v874_v49, %s2207_s3 }
 0x1e2   :  { %v831_v53 = vpop.permute.xlu0 %830  ;;  %2097 = vrcp.f32 %v770_v55 }
 0x1e3   :  { %v875_v54 = vmul.f32 %v2971_v51, %v831_v53 }
 0x1e5   :  { %914 = vrot.lane.b32.xlu0 %v875_v54, %s2207_s3 }
 0x1e6   :  { %v833_v57 = vpop.permute.xlu1 %832  ;;  %v2995_v49 = vpop.eup %2089 }
 0x1e7   :  { %v876_v59 = vmul.f32 %v2975_v56, %v833_v57  ;;  %v1805_v57 = vmul.f32 -1.442695, %v2922_v44 }
 0x1e8   :  { %v2092_v58 = vpop.eup %2091 }
 0x1e9   :  { %916 = vrot.lane.b32.xlu1 %v876_v59, %s2207_s3  ;;  %2099 = vpow2.f32 %v1805_v57  ;;  %v771_v59 = vadd.f32 1.0, %v2092_v58  ;;  %v3000_v60 = vpop.eup %2093 }
 0x1ea   :  { %v835_v63 = vpop.permute.xlu0 %834  ;;  %v2096_v4 = vpop.eup %2095 }
 0x1eb   :  { %v877_v0 = vmul.f32 %v2980_v62, %v835_v63  ;;  %2101 = vrcp.f32 %v771_v59  ;;  %v773_v9 = vadd.f32 1.0, %v2096_v4 }
 0x1ed   :  { %918 = vrot.lane.b32.xlu0 %v877_v0, %s2207_s3 }
 0x1ef   :  { %v837_v6 = vpop.permute.xlu1 %836 }
 0x1f0   :  { %v878_v10 = vmul.f32 %v2984_v5, %v837_v6  ;;  %v1807_v6 = vmul.f32 -1.442695, %v2931_v50 }
 0x1f2   :  { %920 = vrot.lane.b32.xlu1 %v878_v10, %s2207_s3  ;;  %v3005_v10 = vpop.eup %2097  ;;  %2103 = vpow2.f32 %v1807_v6 }
 0x1f3   :  { %2105 = vrcp.f32 %v773_v9 }
 0x1f6   :  { %v2100_v11 = vpop.eup %2099 }
 0x1f9   :  { %v839_v16 = vpop.permute.xlu0 %838 }
 0x1fa   :  { %v879_v41 = vmul.f32 %v2990_v15, %v839_v16  ;;  %v772_v16 = vadd.f32 1.0, %v2100_v11 }
 0x1fc   :  { %922 = vrot.lane.b32.xlu0 %v879_v41, %s2207_s3  ;;  %v3009_v41 = vpop.eup %2101  ;;  %2107 = vrcp.f32 %v772_v16 }
 0x1fd   :  { %2109 = vpow2.f32 %v1808_v43 }
 0x202   :  { %v841_v53 = vpop.permute.xlu1 %840 }
 0x203   :  { %v880_v54 = vmul.f32 %v2995_v49, %v841_v53  ;;  %v2104_v53 = vpop.eup %2103 }
 0x204   :  { %v774_v58 = vadd.f32 1.0, %v2104_v53 }
 0x205   :  { %924 = vrot.lane.b32.xlu1 %v880_v54, %s2207_s3  ;;  %v3014_v54 = vpop.eup %2105 }
 0x206   :  { %2111 = vrcp.f32 %v774_v58 }
 0x209   :  { %v3018_v59 = vpop.eup %2107 }
 0x20a   :  { %v2110_v4 = vpop.eup %2109 }
 0x20b   :  { %v775_v6 = vadd.f32 1.0, %v2110_v4 }
 0x20c   :  { %v843_v63 = vpop.permute.xlu0 %842 }
 0x20d   :  { %v881_v0 = vmul.f32 %v3000_v60, %v843_v63  ;;  %2113 = vrcp.f32 %v775_v6 }
 0x20f   :  { %926 = vrot.lane.b32.xlu0 %v881_v0, %s2207_s3 }
 0x213   :  { %v3022_v9 = vpop.eup %2111 }
 0x216   :  { %v845_v12 = vpop.permute.xlu1 %844 }
 0x217   :  { %v882_v13 = vmul.f32 %v3005_v10, %v845_v12 }
 0x219   :  { %928 = vrot.lane.b32.xlu1 %v882_v13, %s2207_s3  ;;  %v1825_v13 = vld [vmem:[%s3367_s4] ss:$0 sm:$0xff]  ;;  %s2209_s4 = smov 80  }
 0x21a   :  { %v3030_v16 = vpop.eup %2113 }
 0x21c   :  { %v847_v47 = vpop.permute.xlu0 %846 }
 0x21d   :  { %v883_v48 = vmul.f32 %v3009_v41, %v847_v47 }
 0x21f   :  { %930 = vrot.lane.b32.xlu0 %v883_v48, %s2207_s3 }
 0x224   :  { %v851_v55 = vpop.permute.xlu0 %850 }
 0x225   :  { %v885_v57 = vmul.f32 %v3014_v54, %v851_v55 }
 0x227   :  { %934 = vrot.lane.b32.xlu0 %v885_v57, %s2207_s3 }
 0x22a   :  { %v849_v63 = vpop.permute.xlu1 %848 }
 0x22b   :  { %v884_v0 = vmul.f32 %v3018_v59, %v849_v63 }
 0x22d   :  { %932 = vrot.lane.b32.xlu1 %v884_v0, %s2207_s3 }
 0x237   :  { %v853_v11 = vpop.permute.xlu1 %852 }
 0x238   :  { %v886_v12 = vmul.f32 %v3022_v9, %v853_v11 }
 0x23a   :  { %936 = vrot.lane.b32.xlu1 %v886_v12, %s2207_s3 }
 0x23e   :  { %1396 = vrot.lane.b32.xlu1 %v1825_v13, %s2208_s13 }
 0x241   :  { %v855_v43 = vpop.permute.xlu0 %854 }
 0x242   :  { %v887_v47 = vmul.f32 %v3030_v16, %v855_v43 }
 0x244   :  { %938 = vrot.lane.b32.xlu0 %v887_v47, %s2207_s3 }
 0x24b   :  { %v909_v48 = vpop.permute.xlu1 %908 }
 0x24c   :  { %1893 = vmatprep.mubr.msk.f32.mxu1 %vm940_vm14, %v909_v48  ;;  %v1372_v48 = vmul.f32 0.01, %v2931_v50 }
 0x24f   :  { %v911_v53 = vpop.permute.xlu0 %910 }
 0x250   :  { %1894 = vmatmul.mubr.msk.f32.vlgmr.msra.gmra.mxu1 %vm940_vm14, %v911_v53  ;;  %v1373_v53 = vmul.f32 0.01, %v2948_v61 }
 0x253   :  { %v913_v55 = vpop.permute.xlu1 %912 }
 0x254   :  { %1896 = vmatprep.mubr.msk.f32.mxu1 %vm940_vm14, %v913_v55 }
 0x257   :  { %v915_v57 = vpop.permute.xlu0 %914 }
 0x258   :  { %1897 = vmatmul.mubr.msk.f32.gmra.mxu1 %vm940_vm14, %v915_v57  ;;  %v1371_v57 = vmul.f32 0.01, %v2914_v40 }
 0x25b   :  { %v917_v58 = vpop.permute.xlu1 %916 }
 0x25c   :  { %1899 = vmatprep.mubr.msk.f32.mxu1 %vm940_vm14, %v917_v58 }
 0x25f   :  { %v919_v63 = vpop.permute.xlu0 %918 }
 0x260   :  { %1900 = vmatmul.mubr.msk.f32.gmra.mxu1 %vm940_vm14, %v919_v63  ;;  %v1389_v63 = vsel %vm1357_vm12, %v2948_v61, %v1373_v53  ;;  %vm1342_vm12 = vcmp.gt.f32.partialorder %v2842_v2, 0.0 }
 0x264   :  { %v921_v0 = vpop.permute.xlu1 %920 }
 0x265   :  { %1902 = vmatprep.mubr.msk.f32.mxu1 %vm940_vm14, %v921_v0  ;;  %v1388_v0 = vsel %vm1356_vm13, %v2931_v50, %v1372_v48  ;;  %vm1479_vm13 = vcmask 130048  }
 0x26e   :  { %v923_v4 = vpop.permute.xlu0 %922 }
 0x26f   :  { %1903 = vmatmul.mubr.msk.f32.gmra.mxu1 %vm940_vm14, %v923_v4  ;;  %v1370_v4 = vmul.f32 0.01, %v2922_v44 }
 0x277   :  { %v925_v6 = vpop.permute.xlu1 %924 }
 0x278   :  { %1905 = vmatprep.mubr.msk.f32.mxu1 %vm940_vm14, %v925_v6 }
 0x281   :  { %v927_v11 = vpop.permute.xlu0 %926 }
 0x282   :  { %1906 = vmatmul.mubr.msk.f32.gmra.mxu1 %vm940_vm14, %v927_v11 }
 0x28b   :  { %v929_v12 = vpop.permute.xlu1 %928 }
 0x28c   :  { %1908 = vmatprep.mubr.msk.f32.mxu1 %vm940_vm14, %v929_v12  ;;  %v1369_v12 = vmul.f32 0.01, %v2908_v38 }
 0x291   :  { %v931_v13 = vpop.permute.xlu0 %930 }
 0x292   :  { %1909 = vmatmul.mubr.msk.f32.gmra.mxu1 %vm940_vm14, %v931_v13  ;;  %v1387_v13 = vsel %vm1355_vm4, %v2914_v40, %v1371_v57 }
 0x299   :  { %v935_v47 = vpop.permute.xlu0 %934 }
 0x29f   :  { %v933_v43 = vpop.permute.xlu1 %932 }
 0x2a0   :  { %1911 = vmatprep.mubr.msk.f32.mxu1 %vm940_vm14, %v933_v43 }
 0x2a1   :  { %1912 = vmatmul.mubr.msk.f32.gmra.mxu1 %vm940_vm14, %v935_v47  ;;  %v1386_v47 = vsel %vm1354_vm0, %v2922_v44, %v1370_v4 }
 0x2ac   :  { %v937_v55 = vpop.permute.xlu1 %936 }
 0x2ad   :  { %1914 = vmatprep.mubr.msk.f32.mxu1 %vm940_vm14, %v937_v55  ;;  %v1368_v55 = vmul.f32 0.01, %v2902_v36 }
 0x2af   :  { %v1384_v4 = vsel %vm1352_vm15, %v2902_v36, %v1368_v55 }
 0x2b0   :  { %v3054_v58 = vpop.permute.xlu1 %1396 }
 0x2b1   :  { %v1414_v6 = vmul.f32 %v3054_v58, %v1389_v63  ;;  %v1413_v11 = vmul.f32 %v3054_v58, %v1388_v0  ;;  %v1412_v43 = vmul.f32 %v3054_v58, %v1387_v13  ;;  %v1411_v53 = vmul.f32 %v3054_v58, %v1386_v47 }
 0x2b2   :  { %v1385_v63 = vsel %vm1353_vm7, %v2908_v38, %v1369_v12  ;;  %v1367_v0 = vmul.f32 0.01, %v2896_v34  ;;  %vm1592_vm7 = vcmask 269312  }
 0x2b3   :  { %1461 = vrot.lane.b32.xlu0 %v1414_v6, %s2208_s13  ;;  %1459 = vrot.lane.b32.xlu1 %v1413_v11, %s2208_s13  ;;  %v1410_v57 = vmul.f32 %v3054_v58, %v1385_v63  ;;  %v1409_v6 = vmul.f32 %v3054_v58, %v1384_v4  ;;  %v1366_v11 = vmul.f32 0.01, %v2890_v32 }
 0x2b4   :  { %v1383_v12 = vsel %vm1351_vm3, %v2896_v34, %v1367_v0 }
 0x2b5   :  { %v1408_v13 = vmul.f32 %v3054_v58, %v1383_v12  ;;  %v1382_v47 = vsel %vm1350_vm1, %v2890_v32, %v1366_v11 }
 0x2b6   :  { %v939_v48 = vpop.permute.xlu0 %938 }
 0x2b7   :  { %1915 = vmatmul.mubr.msk.f32.gmra.mxu1 %vm940_vm14, %v939_v48  ;;  %1457 = vrot.lane.b32.xlu0 %v1412_v43, %s2208_s13  ;;  %v1365_v43 = vmul.f32 0.01, %v2884_v29  ;;  %v1407_v48 = vmul.f32 %v3054_v58, %v1382_v47 }
 0x2b8   :  { %1455 = vrot.lane.b32.xlu1 %v1411_v53, %s2208_s13  ;;  %v1364_v53 = vmul.f32 0.01, %v2878_v27 }
 0x2b9   :  { %v1381_v55 = vsel %vm1349_vm5, %v2884_v29, %v1365_v43 }
 0x2ba   :  { %v1406_v63 = vmul.f32 %v3054_v58, %v1381_v55  ;;  %v1380_v0 = vsel %vm1348_vm9, %v2878_v27, %v1364_v53 }
 0x2bb   :  { %1453 = vrot.lane.b32.xlu0 %v1410_v57, %s2208_s13  ;;  %v1363_v57 = vmul.f32 0.01, %v2872_v25  ;;  %v1405_v4 = vmul.f32 %v3054_v58, %v1380_v0 }
 0x2bd   :  { %v1379_v11 = vsel %vm1347_vm2, %v2872_v25, %v1363_v57 }
 0x2be   :  { %v1404_v12 = vmul.f32 %v3054_v58, %v1379_v11 }
 0x2bf   :  { %1451 = vrot.lane.b32.xlu0 %v1409_v6, %s2208_s13  ;;  %v1362_v6 = vmul.f32 0.01, %v2866_v1 }
 0x2c1   :  { %v1378_v43 = vsel %vm1346_vm6, %v2866_v1, %v1362_v6 }
 0x2c2   :  { %v1403_v47 = vmul.f32 %v3054_v58, %v1378_v43 }
 0x2c3   :  { %1449 = vrot.lane.b32.xlu0 %v1408_v13, %s2208_s13  ;;  %v1361_v13 = vmul.f32 0.01, %v2860_v23 }
 0x2c5   :  { %v1377_v53 = vsel %vm1345_vm8, %v2860_v23, %v1361_v13 }
 0x2c6   :  { %v1402_v55 = vmul.f32 %v3054_v58, %v1377_v53 }
 0x2c7   :  { %1447 = vrot.lane.b32.xlu0 %v1407_v48, %s2208_s13  ;;  %v1360_v48 = vmul.f32 0.01, %v2854_v21 }
 0x2c9   :  { %v1376_v57 = vsel %vm1344_vm10, %v2854_v21, %v1360_v48 }
 0x2ca   :  { %v1401_v0 = vmul.f32 %v3054_v58, %v1376_v57 }
 0x2cb   :  { %1445 = vrot.lane.b32.xlu0 %v1406_v63, %s2208_s13  ;;  %v1359_v63 = vmul.f32 0.01, %v2848_v19 }
 0x2cd   :  { %v1375_v6 = vsel %vm1343_vm11, %v2848_v19, %v1359_v63 }
 0x2ce   :  { %v1400_v11 = vmul.f32 %v3054_v58, %v1375_v6 }
 0x2cf   :  { %1443 = vrot.lane.b32.xlu0 %v1405_v4, %s2208_s13  ;;  %v1358_v4 = vmul.f32 0.01, %v2842_v2 }
 0x2d3   :  { %1441 = vrot.lane.b32.xlu0 %v1404_v12, %s2208_s13  ;;  %v1374_v12 = vsel %vm1342_vm12, %v2842_v2, %v1358_v4 }
 0x2d4   :  { %v1399_v13 = vmul.f32 %v3054_v58, %v1374_v12 }
 0x2d7   :  { %1439 = vrot.lane.b32.xlu0 %v1403_v47, %s2208_s13 }
 0x2db   :  { %1437 = vrot.lane.b32.xlu0 %v1402_v55, %s2208_s13 }
 0x2df   :  { %1435 = vrot.lane.b32.xlu0 %v1401_v0, %s2208_s13 }
 0x2e3   :  { %1433 = vrot.lane.b32.xlu0 %v1400_v11, %s2208_s13 }
 0x2e7   :  { %1431 = vrot.lane.b32.xlu0 %v1399_v13, %s2208_s13 }
 0x310   :  { %v1895_v6 = vpop.f32.mrf.mxu1 }
 0x312   :  { %v1039_v12 = vpop.f32.mrf.mxu1 }
 0x325   :  { %v1462_v43 = vpop.permute.xlu0 %1461  ;;  %v1460_v47 = vpop.permute.xlu1 %1459 }
 0x326   :  { %v1525_v48 = vsel %vm1479_vm13, %v1462_v43, 0.0  ;;  %v1522_v53 = vsel %vm1479_vm13, %v1460_v47, 0.0  ;;  %v1898_v47 = vpop.f32.mrf.mxu1 }
 0x327   :  { %1523 = vadd.xlane.f32.xlu1 %v1522_v53  ;;  %1526 = vadd.xlane.f32.xlu0 %v1525_v48 }
 0x328   :  { %v1049_v53 = vpop.f32.mrf.mxu1 }
 0x329   :  { %v1458_v55 = vpop.permute.xlu0 %1457 }
 0x32a   :  { %v1519_v63 = vsel %vm1479_vm13, %v1458_v55, 0.0  ;;  %v1456_v57 = vpop.permute.xlu1 %1455 }
 0x32b   :  { %1520 = vadd.xlane.f32.xlu0 %v1519_v63  ;;  %v1516_v4 = vsel %vm1479_vm13, %v1456_v57, 0.0  ;;  %v1901_v57 = vpop.f32.mrf.mxu1 }
 0x32d   :  { %v1454_v0 = vpop.permute.xlu0 %1453 }
 0x32e   :  { %v1513_v58 = vsel %vm1479_vm13, %v1454_v0, 0.0 }
 0x32f   :  { %1517 = vadd.xlane.f32.xlu0 %v1516_v4  ;;  %v1059_v4 = vpop.f32.mrf.mxu1 }
 0x331   :  { %v1452_v11 = vpop.permute.xlu0 %1451 }
 0x335   :  { %v1450_v13 = vpop.permute.xlu0 %1449 }
 0x336   :  { %v1507_v43 = vsel %vm1479_vm13, %v1450_v13, 0.0 }
 0x338   :  { %1134 = vrot.lane.b32.xlu1 %v1039_v12, %s2209_s4  ;;  %v1904_v12 = vpop.f32.mrf.mxu1 }
 0x339   :  { %v1448_v48 = vpop.permute.xlu0 %1447 }
 0x33c   :  { %1138 = vrot.lane.b32.xlu1 %v1049_v53, %s2209_s4  ;;  %v1069_v53 = vpop.f32.mrf.mxu1 }
 0x33d   :  { %v1446_v55 = vpop.permute.xlu0 %1445 }
 0x33e   :  { %v1501_v63 = vsel %vm1479_vm13, %v1446_v55, 0.0 }
 0x340   :  { %1144 = vrot.lane.b32.xlu1 %v1901_v57, %s2209_s4 }
 0x341   :  { %v1444_v0 = vpop.permute.xlu0 %1443 }
 0x342   :  { %v1907_v55 = vpop.f32.mrf.mxu1 }
 0x344   :  { %1142 = vrot.lane.b32.xlu1 %v1059_v4, %s2209_s4  ;;  %v1079_v57 = vpop.f32.mrf.mxu1 }
 0x345   :  { %v1442_v30 = vpop.permute.xlu0 %1441  ;;  %1136 = vrot.lane.b32.xlu0 %v1895_v6, %s2209_s4 }
 0x346   :  { %v1495_v13 = vsel %vm1479_vm13, %v1442_v30, 0.0 }
 0x348   :  { %1148 = vrot.lane.b32.xlu1 %v1904_v12, %s2209_s4 }
 0x349   :  { %1140 = vrot.lane.b32.xlu0 %v1898_v47, %s2209_s4  ;;  %v1440_v47 = vpop.permute.xlu0 %1439 }
 0x34c   :  { %1146 = vrot.lane.b32.xlu1 %v1069_v53, %s2209_s4  ;;  %v1510_v53 = vsel %vm1479_vm13, %v1452_v11, 0.0 }
 0x34d   :  { %v1438_v17 = vpop.permute.xlu0 %1437 }
 0x350   :  { %1152 = vrot.lane.b32.xlu1 %v1907_v55, %s2209_s4  ;;  %v1504_v55 = vsel %vm1479_vm13, %v1448_v48, 0.0 }
 0x352   :  { %v1910_v4 = vpop.f32.mrf.mxu1 }
 0x354   :  { %1150 = vrot.lane.b32.xlu1 %v1079_v57, %s2209_s4  ;;  %v1089_v6 = vpop.f32.mrf.mxu1  ;;  %v1498_v57 = vsel %vm1479_vm13, %v1444_v0, 0.0 }
 0x358   :  { %1156 = vrot.lane.b32.xlu1 %v1910_v4, %s2209_s4  ;;  %v1436_v4 = vpop.permute.xlu0 %1435 }
 0x359   :  { %v1486_v48 = vsel %vm1479_vm13, %v1436_v4, 0.0 }
 0x35c   :  { %1154 = vrot.lane.b32.xlu1 %v1089_v6, %s2209_s4  ;;  %v1492_v6 = vsel %vm1479_vm13, %v1440_v47, 0.0  ;;  %v1434_v20 = vpop.permute.xlu0 %1433 }
 0x35d   :  { %v1483_v11 = vsel %vm1479_vm13, %v1434_v20, 0.0 }
 0x361   :  { %v1913_v30 = vpop.f32.mrf.mxu1 }
 0x362   :  { %1160 = vrot.lane.b32.xlu1 %v1913_v30, %s2209_s4  ;;  %v1489_v30 = vsel %vm1479_vm13, %v1438_v17, 0.0 }
 0x363   :  { %v1099_v12 = vpop.f32.mrf.mxu1 }
 0x366   :  { %1158 = vrot.lane.b32.xlu1 %v1099_v12, %s2209_s4 }
 0x368   :  { %1511 = vadd.xlane.f32.xlu0 %v1510_v53 }
 0x36c   :  { %1505 = vadd.xlane.f32.xlu0 %v1504_v55 }
 0x370   :  { %1499 = vadd.xlane.f32.xlu0 %v1498_v57 }
 0x374   :  { %1493 = vadd.xlane.f32.xlu0 %v1492_v6 }
 0x377   :  { %v1916_v18 = vpop.f32.mrf.mxu1 }
 0x378   :  { %1164 = vrot.lane.b32.xlu1 %v1916_v18, %s2209_s4  ;;  %1490 = vadd.xlane.f32.xlu0 %v1489_v30 }
 0x379   :  { %v1109_v12 = vpop.f32.mrf.mxu1 }
 0x37c   :  { %1162 = vrot.lane.b32.xlu1 %v1109_v12, %s2209_s4  ;;  %1484 = vadd.xlane.f32.xlu0 %v1483_v11 }
 0x3a0   :  { %1514 = vadd.xlane.f32.xlu1 %v1513_v58 }
 0x3a4   :  { %1508 = vadd.xlane.f32.xlu1 %v1507_v43 }
 0x3a8   :  { %1502 = vadd.xlane.f32.xlu1 %v1501_v63 }
 0x3ac   :  { %1496 = vadd.xlane.f32.xlu1 %v1495_v13 }
 0x3b0   :  { %v3163_v0 = vpop.xlane.xlu1 %1523  ;;  %1487 = vadd.xlane.f32.xlu1 %v1486_v48 }
 0x3b4   :  { %v1135_v17 = vpop.permute.xlu1 %1134 }
 0x3b8   :  { %v1139_v47 = vpop.permute.xlu1 %1138 }
 0x3bc   :  { %v3165_v53 = vpop.permute.xlu1 %1144 }
 0x3c0   :  { %v1143_v18 = vpop.permute.xlu1 %1142 }
 0x3c4   :  { %v1149_v55 = vpop.permute.xlu1 %1148 }
 0x3c8   :  { %v1147_v20 = vpop.permute.xlu1 %1146 }
 0x3cc   :  { %v1153_v57 = vpop.permute.xlu1 %1152 }
 0x3d0   :  { %v1151_v6 = vpop.permute.xlu1 %1150 }
 0x3d4   :  { %v1157_v30 = vpop.permute.xlu1 %1156 }
 0x3d8   :  { %v1155_v11 = vpop.permute.xlu1 %1154 }
 0x3d9   :  { %v1192_v7 = vadd.f32 %v1155_v11, %v2902_v36 }
 0x3dc   :  { %v1161_v58 = vpop.permute.xlu1 %1160 }
 0x3dd   :  { %v1195_v43 = vadd.f32 %v1161_v58, %v2914_v40  ;;  %v1191_v40 = vadd.f32 %v1153_v57, %v2896_v34  ;;  %v1182_v34 = vadd.f32 %v1135_v17, %v2842_v2  ;;  %v1187_v58 = vadd.f32 %v3165_v53, %v2872_v25 }
 0x3df   :  { %2115 = vtanh.f32 %v1195_v43 }
 0x3e0   :  { %v1159_v63 = vpop.permute.xlu1 %1158 }
 0x3e1   :  { %v1194_v13 = vadd.f32 %v1159_v63, %v2922_v44  ;;  %v1190_v44 = vadd.f32 %v1151_v6, %v2890_v32  ;;  %v1193_v6 = vadd.f32 %v1157_v30, %v2908_v38 }
 0x3e3   :  { %2117 = vtanh.f32 %v1194_v13 }
 0x3ea   :  { %v1165_v4 = vpop.permute.xlu1 %1164 }
 0x3eb   :  { %v1197_v12 = vadd.f32 %v1165_v4, %v2948_v61  ;;  %v1189_v61 = vadd.f32 %v1149_v55, %v2884_v29  ;;  %v1184_v29 = vadd.f32 %v1139_v47, %v2854_v21 }
 0x3ec   :  { %v2116_v48 = vpop.eup %2115 }
 0x3ed   :  { %2119 = vtanh.f32 %v1197_v12  ;;  %1288 = vrot.lane.b32.xlu0 %v2116_v48, %s2210_s14 }
 0x3ee   :  { %v1163_v14 = vpop.permute.xlu1 %1162  ;;  %2121 = vtanh.f32 %v1192_v7  ;;  %v1432_v7 = vpop.permute.xlu0 %1431 }
 0x3ef   :  { %v1196_v8 = vadd.f32 %v1163_v14, %v2931_v50  ;;  %v1188_v50 = vadd.f32 %v1147_v20, %v2878_v27  ;;  %v1480_v2 = vsel %vm1479_vm13, %v1432_v7, 0.0  ;;  %v1226_v7 = vsub.f32 1.0, %v3018_v59 }
 0x3f0   :  { %v2118_v26 = vpop.eup %2117 }
 0x3f1   :  { %2123 = vtanh.f32 %v1196_v8  ;;  %1286 = vrot.lane.b32.xlu1 %v2118_v26, %s2210_s14  ;;  %v1186_v8 = vadd.f32 %v1143_v18, %v2866_v1 }
 0x3f2   :  { %2125 = vtanh.f32 %v1191_v40  ;;  %v1527_v1 = vpop.xlane.xlu0 %1526 }
 0x3f3   :  { %2127 = vtanh.f32 %v1190_v44  ;;  %v3207_v44 = vld [vmem:[%s3364_s1] ss:$0 sm:$0xff]  ;;  %s2211_s1 = smov [#allocation2]  }
 0x3f4   :  { %2129 = vtanh.f32 %v1189_v61  ;;  %s1709_s17 = sshll.u32 %s2211_s1, 4  ;;  %s1710_s17 = int_to_ptr.vmem [resolvable:$true] %s1709_s17 }
 0x3f5   :  { %2131 = vtanh.f32 %v1188_v50  ;;  %s2179_s18 = scalar_lea.vmem %s1710_s17, 256  ;;  %p2184_p1 = scmp.lt.s32.totalorder %s1710_s17, %s1710_s17 }
 0x3f6   :  { %2133 = vtanh.f32 %v1186_v8  ;;  %v1521_v21 = vpop.xlane.xlu0 %1520  ;;  %p2180_p0 = scmp.ne.s32.totalorder %s1710_s17, %s2179_s18  ;;  %p2185_p2 = scmp.lt.s32.totalorder %s2179_s18, %s2179_s18 }
 0x3f7   :  { %2135 = vtanh.f32 %v1184_v29 }
 0x3f8   :  { %2137 = vtanh.f32 %v1182_v34  ;;  %p2186_p3 = por %p2185_p2, %p2184_p1 }
 0x3f9   :  { %2139 = vtanh.f32 %v1193_v6  ;;  %v1556_v6 = vmul.f32 1.442695, %v3163_v0  ;;  %v1224_v0 = vsub.f32 1.0, %v3005_v10 }
 0x3fa   :  { %v2120_v36 = vpop.eup %2119  ;;  %v1518_v57 = vpop.xlane.xlu0 %1517  ;;  %2141 = vtanh.f32 %v1187_v58  ;;  %p2187_p4 = pnand %p2186_p3, %p2180_p0 }
 0x3fb   :  { %1292 = vrot.lane.b32.xlu1 %v2120_v36, %s2210_s14  ;;  %v2122_v11 = vpop.eup %2121  ;;  %v1552_v29 = vmul.f32 1.442695, %v1518_v57  ;;  %v1242_v57 = vmul.f32 %v1226_v7, %v2924_v45  ;;  %v1240_v7 = vmul.f32 %v1224_v0, %v2904_v37  ;;  %v1222_v37 = vsub.f32 1.0, %v2995_v49 }
 0x3fe   :  { %v2124_v14 = vpop.eup %2123  ;;  %v1137_v17 = vpop.permute.xlu0 %1136 }
 0x3ff   :  { %1282 = vrot.lane.b32.xlu1 %v2122_v11, %s2210_s14  ;;  %1290 = vrot.lane.b32.xlu0 %v2124_v14, %s2210_s14  ;;  %v2126_v26 = vpop.eup %2125  ;;  %v1183_v13 = vadd.f32 %v1137_v17, %v2848_v19  ;;  %v3390_v19 = vlaneseq  ;;  %v3391_v11 = vmov 1.0   ;;  %v1554_v14 = vmul.f32 1.442695, %v1521_v21 }
 0x400   :  { %v2128_v32 = vpop.eup %2127  ;;  %v1558_v21 = vmul.f32 1.442695, %v1527_v1  ;;  %v1229_v1 = vsub.f32 1.0, %v3030_v16 }
 0x401   :  { %v2130_v27 = vpop.eup %2129  ;;  %v1610_v40 = vshrl.u32 %v3390_v19, 7 }
 0x402   :  { %v2132_v55 = vpop.eup %2131  ;;  %v1141_v43 = vpop.permute.xlu0 %1140 }
 0x403   :  { %1280 = vrot.lane.b32.xlu1 %v2126_v26, %s2210_s14  ;;  %v2134_v18 = vpop.eup %2133  ;;  %v1185_v63 = vadd.f32 %v1141_v43, %v2860_v23  ;;  %v3209_v61 = vadd.s32 8, %v1610_v40  ;;  %vm1617_vm4 = vcmp.eq.s32.totalorder %v1610_v40, %v3207_v44 }
 0x404   :  { %v2136_v47 = vpop.eup %2135  ;;  %1949 = vmatprep.mubr.msk.f32.mxu1 %vm1617_vm4, %v3391_v11 }
 0x405   :  { %v2138_v20 = vpop.eup %2137  ;;  %2143 = vtanh.f32 %v1185_v63  ;;  %vm1618_vm0 = vcmp.eq.s32.totalorder %v3209_v61, %v3207_v44 }
 0x406   :  { %2145 = vtanh.f32 %v1183_v13  ;;  %v2140_v4 = vpop.eup %2139  ;;  %v1512_v38 = vpop.xlane.xlu0 %1511 }
 0x407   :  { %1278 = vrot.lane.b32.xlu1 %v2128_v32, %s2210_s14  ;;  %v2142_v12 = vpop.eup %2141  ;;  %2147 = vpow2.f32 %v1554_v14  ;;  %v1548_v43 = vmul.f32 1.442695, %v1512_v38  ;;  %v1228_v38 = vsub.f32 1.0, %v3022_v9 }
 0x408   :  { %2149 = vpow2.f32 %v1552_v29 }
 0x409   :  { %2151 = vpow2.f32 %v1558_v21 }
 0x40a   :  { %v1506_v53 = vpop.xlane.xlu0 %1505  ;;  %2153 = vpow2.f32 %v1556_v6 }
 0x40b   :  { %1276 = vrot.lane.b32.xlu1 %v2130_v27, %s2210_s14  ;;  %v1227_v27 = vsub.f32 1.0, %v3014_v54  ;;  %2155 = vpow2.f32 %v1548_v43 }
 0x40e   :  { %v1500_v23 = vpop.xlane.xlu0 %1499 }
 0x40f   :  { %1274 = vrot.lane.b32.xlu1 %v2132_v55, %s2210_s14 }
 0x412   :  { %v2144_v48 = vpop.eup %2143  ;;  %v3215_v50 = vpop.xlane.xlu0 %1493 }
 0x413   :  { %1270 = vrot.lane.b32.xlu1 %v2134_v18, %s2210_s14  ;;  %v2146_v25 = vpop.eup %2145 }
 0x414   :  { %v2148_v17 = vpop.eup %2147 }
 0x416   :  { %v3217_v26 = vpop.xlane.xlu0 %1490 }
 0x417   :  { %1266 = vrot.lane.b32.xlu1 %v2136_v47, %s2210_s14  ;;  %v1243_v47 = vmul.f32 %v1227_v27, %v2917_v42  ;;  %v1223_v27 = vsub.f32 1.0, %v3000_v60 }
 0x41a   :  { %v3221_v34 = vpop.xlane.xlu0 %1484 }
 0x41b   :  { %1262 = vrot.lane.b32.xlu1 %v2138_v20, %s2210_s14 }
 0x41e   :  { %1481 = vadd.xlane.f32.xlu0 %v1480_v2 }
 0x429   :  { %v3201_v30 = vpop.xlane.xlu1 %1514 }
 0x42d   :  { %v1509_v36 = vpop.xlane.xlu1 %1508 }
 0x42e   :  { %v1546_v42 = vmul.f32 1.442695, %v1509_v36 }
 0x430   :  { %2157 = vpow2.f32 %v1546_v42 }
 0x431   :  { %v1503_v8 = vpop.xlane.xlu1 %1502 }
 0x432   :  { %v1542_v14 = vmul.f32 1.442695, %v1503_v8 }
 0x434   :  { %1284 = vrot.lane.b32.xlu0 %v2140_v4, %s2210_s14 }
 0x435   :  { %v3219_v32 = vpop.xlane.xlu1 %1496 }
 0x438   :  { %1272 = vrot.lane.b32.xlu0 %v2142_v12, %s2210_s14 }
 0x439   :  { %v3225_v55 = vpop.xlane.xlu1 %1487 }
 0x43c   :  { %1268 = vrot.lane.b32.xlu0 %v2144_v48, %s2210_s14  ;;  %v2150_v48 = vpop.eup %2149 }
 0x43d   :  { %v2152_v36 = vpop.eup %2151 }
 0x440   :  { %1264 = vrot.lane.b32.xlu0 %v2146_v25, %s2210_s14  ;;  %v1544_v25 = vmul.f32 1.442695, %v1506_v53  ;;  %v1244_v53 = vmul.f32 %v1228_v38, %v2933_v52  ;;  %v1239_v52 = vmul.f32 %v1223_v27, %v2898_v35  ;;  %v1221_v35 = vsub.f32 1.0, %v2990_v15 }
 0x442   :  { %2159 = vpow2.f32 %v1544_v25 }
 0x443   :  { %2161 = vpow2.f32 %v1542_v14 }
 0x45f   :  { %v1289_v18 = vpop.permute.xlu0 %1288 }
 0x460   :  { %v1323_v20 = vmul.f32 %v3014_v54, %v1289_v18 }
 0x462   :  { %v1339_v2 = vadd.f32 %v1323_v20, %v1243_v47 }
 0x463   :  { %v1287_v58 = vpop.permute.xlu1 %1286 }
 0x464   :  { %v1573_v63 = vmul.f32 %v2148_v17, %v1339_v2  ;;  %v1322_v13 = vmul.f32 %v3018_v59, %v1287_v58  ;;  %v1245_v59 = vmul.f32 %v1229_v1, %v2953_v3  ;;  %v1540_v3 = vmul.f32 1.442695, %v1500_v23 }
 0x465   :  { %v1536_v23 = vmul.f32 1.442695, %v3215_v50  ;;  %v1532_v50 = vmul.f32 1.442695, %v3225_v55 }
 0x466   :  { %v1338_v4 = vadd.f32 %v1322_v13, %v1242_v57  ;;  %v1589_v12 = vsel %vm940_vm14, %v1573_v63, %v2148_v17  ;;  %2163 = vpow2.f32 %v1540_v3 }
 0x467   :  { %2165 = vpow2.f32 %v1536_v23  ;;  %v1219_v23 = vsub.f32 1.0, %v2980_v62 }
 0x468   :  { %v1572_v54 = vmul.f32 %v2150_v48, %v1338_v4  ;;  %2167 = vpow2.f32 %v1532_v50 }
 0x46a   :  { %v1588_v45 = vsel %vm940_vm14, %v1572_v54, %v2150_v48  ;;  %v1238_v54 = vmul.f32 %v1222_v37, %v2892_v33  ;;  %v1220_v33 = vsub.f32 1.0, %v2984_v5 }
 0x46c   :  { %v1236_v27 = vmul.f32 %v1220_v33, %v2880_v28 }
 0x46d   :  { %v1293_v19 = vpop.permute.xlu1 %1292 }
 0x46e   :  { %v1325_v40 = vmul.f32 %v3030_v16, %v1293_v19  ;;  %v2154_v16 = vpop.eup %2153 }
 0x46f   :  { %v2156_v6 = vpop.eup %2155 }
 0x470   :  { %v1341_v29 = vadd.f32 %v1325_v40, %v1245_v59  ;;  %v2158_v48 = vpop.eup %2157 }
 0x471   :  { %v1283_v18 = vpop.permute.xlu1 %1282  ;;  %v1291_v47 = vpop.permute.xlu0 %1290 }
 0x472   :  { %v1575_v21 = vmul.f32 %v2152_v36, %v1341_v29  ;;  %v1320_v20 = vmul.f32 %v3005_v10, %v1283_v18  ;;  %v1324_v2 = vmul.f32 %v3022_v9, %v1291_v47  ;;  %v2160_v38 = vpop.eup %2159  ;;  %v1216_v47 = vsub.f32 1.0, %v2967_v46 }
 0x473   :  { %v2162_v14 = vpop.eup %2161 }
 0x474   :  { %v1336_v8 = vadd.f32 %v1320_v20, %v1240_v7  ;;  %v1340_v17 = vadd.f32 %v1324_v2, %v1244_v53  ;;  %v1591_v57 = vsel %vm940_vm14, %v1575_v21, %v2152_v36  ;;  %v1218_v36 = vsub.f32 1.0, %v2975_v56 }
 0x475   :  { %v1281_v58 = vpop.permute.xlu1 %1280  ;;  %1917 = vmatprep.subr.msk.mxu1 %vm1592_vm7, %v1591_v57 }
 0x476   :  { %v1570_v43 = vmul.f32 %v2156_v6, %v1336_v8  ;;  %v1574_v10 = vmul.f32 %v2154_v16, %v1340_v17  ;;  %v1319_v9 = vmul.f32 %v3000_v60, %v1281_v58  ;;  %1918 = vmatpush3.msk.msra.mxu1 %vm1592_vm7, %v1591_v57  ;;  %v1234_v21 = vmul.f32 %v1218_v36, %v2868_v24 }
 0x478   :  { %v1335_v63 = vadd.f32 %v1319_v9, %v1239_v52  ;;  %v1590_v13 = vsel %vm940_vm14, %v1574_v10, %v2154_v16  ;;  %v3253_v4 = vsel %vm940_vm14, %v1570_v43, %v2156_v6  ;;  %v1538_v43 = vmul.f32 1.442695, %v3219_v32 }
 0x479   :  { %v1279_v42 = vpop.permute.xlu1 %1278  ;;  %1919 = vmatprep.subr.msk.mxu1 %vm1592_vm7, %v1590_v13  ;;  %v1534_v10 = vmul.f32 1.442695, %v3217_v26  ;;  %v1530_v32 = vmul.f32 1.442695, %v3221_v34  ;;  %v3392_v26 = vld [vmem:[#allocation8_spill] sm:$0xff] }
 0x47a   :  { %v1569_v60 = vmul.f32 %v2158_v48, %v1335_v63  ;;  %v1318_v1 = vmul.f32 %v2995_v49, %v1279_v42  ;;  %1920 = vmatpush3.msk.msra.mxu1 %vm1592_vm7, %v1590_v13  ;;  %v1237_v49 = vmul.f32 %v1221_v35, %v2886_v31  ;;  %v2164_v31 = vpop.eup %2163 }
 0x47b   :  { %1921 = vmatprep.subr.msk.mxu1 %vm1592_vm7, %v1589_v12  ;;  %v2166_v28 = vpop.eup %2165 }
 0x47c   :  { %v1334_v25 = vadd.f32 %v1318_v1, %v1238_v54  ;;  %1922 = vmatpush3.msk.msra.mxu1 %vm1592_vm7, %v1589_v12  ;;  %v3264_v0 = vsel %vm940_vm14, %v1569_v60, %v2158_v48  ;;  %v2168_v58 = vpop.eup %2167  ;;  %v1235_v54 = vmul.f32 %v1219_v23, %v3392_v26 }
 0x47d   :  { %v1277_v19 = vpop.permute.xlu1 %1276  ;;  %1923 = vmatprep.subr.msk.mxu1 %vm1592_vm7, %v1588_v45 }
 0x47e   :  { %v1568_v59 = vmul.f32 %v2160_v38, %v1334_v25  ;;  %v1317_v40 = vmul.f32 %v2990_v15, %v1277_v19  ;;  %1924 = vmatpush3.msk.msra.mxu1 %vm1592_vm7, %v1588_v45 }
 0x480   :  { %v1333_v55 = vadd.f32 %v1317_v40, %v1237_v49  ;;  %v3272_v12 = vsel %vm940_vm14, %v1568_v59, %v2160_v38 }
 0x481   :  { %v1275_v29 = vpop.permute.xlu1 %1274 }
 0x482   :  { %v1567_v7 = vmul.f32 %v2162_v14, %v1333_v55  ;;  %v1316_v53 = vmul.f32 %v2984_v5, %v1275_v29  ;;  %v1232_v5 = vmul.f32 %v1216_v47, %v2856_v22  ;;  %v3397_v47 = vld [vmem:[#allocation5_spill] sm:$0xff] }
 0x484   :  { %v1332_v18 = vadd.f32 %v1316_v53, %v1236_v27  ;;  %v3278_v15 = vsel %vm940_vm14, %v1567_v7, %v2162_v14  ;;  %v3394_v14 = vld [vmem:[#allocation10_spill] sm:$0xff]  ;;  %v3395_v7 = vld [vmem:[#allocation9_spill] sm:$0xff] }
 0x485   :  { %v1271_v45 = vpop.permute.xlu1 %1270  ;;  %v1215_v29 = vsub.f32 1.0, %v3394_v14  ;;  %v1214_v53 = vsub.f32 1.0, %v3395_v7 }
 0x486   :  { %v1566_v20 = vmul.f32 %v2164_v31, %v1332_v18  ;;  %v1314_v2 = vmul.f32 %v2975_v56, %v1271_v45  ;;  %v1550_v56 = vmul.f32 1.442695, %v3201_v30  ;;  %v1217_v30 = vsub.f32 1.0, %v2971_v51 }
 0x488   :  { %v1330_v3 = vadd.f32 %v1314_v2, %v1234_v21  ;;  %v3284_v16 = vsel %vm940_vm14, %v1566_v20, %v2164_v31  ;;  %2169 = vpow2.f32 %v1550_v56  ;;  %v3396_v31 = vld [vmem:[#allocation6_spill] sm:$0xff]  ;;  %v1230_v21 = vmul.f32 %v1214_v53, %v3397_v47 }
 0x489   :  { %v1267_v8 = vpop.permute.xlu1 %1266  ;;  %2171 = vpow2.f32 %v1538_v43  ;;  %v1231_v18 = vmul.f32 %v1215_v29, %v3396_v31 }
 0x48a   :  { %v1564_v17 = vmul.f32 %v2166_v28, %v1330_v3  ;;  %v1312_v57 = vmul.f32 %v2967_v46, %v1267_v8  ;;  %v1225_v46 = vsub.f32 1.0, %v3009_v41  ;;  %2173 = vpow2.f32 %v1534_v10 }
 0x48b   :  { %2175 = vpow2.f32 %v1530_v32 }
 0x48c   :  { %v1328_v6 = vadd.f32 %v1312_v57, %v1232_v5  ;;  %v3289_v37 = vsel %vm940_vm14, %v1564_v17, %v2166_v28  ;;  %v1241_v63 = vmul.f32 %v1225_v46, %v2910_v39 }
 0x48d   :  { %v1263_v27 = vpop.permute.xlu1 %1262 }
 0x48e   :  { %v1562_v24 = vmul.f32 %v2168_v58, %v1328_v6 }
 0x490   :  { %v3292_v52 = vsel %vm940_vm14, %v1562_v24, %v2168_v58 }
 0x495   :  { %v2170_v42 = vpop.eup %2169 }
 0x496   :  { %v2172_v19 = vpop.eup %2171 }
 0x497   :  { %v2174_v40 = vpop.eup %2173 }
 0x4a7   :  { %v1482_v22 = vpop.xlane.xlu0 %1481 }
 0x4a8   :  { %v1528_v60 = vmul.f32 1.442695, %v1482_v22 }
 0x4aa   :  { %2177 = vpow2.f32 %v1528_v60 }
 0x4ab   :  { %v1285_v9 = vpop.permute.xlu0 %1284 }
 0x4ac   :  { %v1321_v13 = vmul.f32 %v3009_v41, %v1285_v9  ;;  %v3393_v41 = vld [vmem:[#allocation7_spill] sm:$0xff] }
 0x4ad   :  { %v1233_v33 = vmul.f32 %v1217_v30, %v3393_v41 }
 0x4ae   :  { %v1337_v48 = vadd.f32 %v1321_v13, %v1241_v63 }
 0x4af   :  { %v1273_v35 = vpop.permute.xlu0 %1272 }
 0x4b0   :  { %v1571_v1 = vmul.f32 %v2170_v42, %v1337_v48  ;;  %v1315_v50 = vmul.f32 %v2980_v62, %v1273_v35 }
 0x4b2   :  { %v1331_v25 = vadd.f32 %v1315_v50, %v1235_v54  ;;  %v1587_v38 = vsel %vm940_vm14, %v1571_v1, %v2170_v42 }
 0x4b3   :  { %v1269_v39 = vpop.permute.xlu0 %1268  ;;  %1925 = vmatprep.subr.msk.mxu1 %vm1592_vm7, %v1587_v38 }
 0x4b4   :  { %v1565_v49 = vmul.f32 %v2172_v19, %v1331_v25  ;;  %v1313_v34 = vmul.f32 %v2971_v51, %v1269_v39  ;;  %1926 = vmatpush3.msk.msra.mxu1 %vm1592_vm7, %v1587_v38 }
 0x4b5   :  { %1927 = vmatprep.subr.msk.mxu1 %vm1592_vm7, %v3253_v4 }
 0x4b6   :  { %v1329_v62 = vadd.f32 %v1313_v34, %v1233_v33  ;;  %1928 = vmatpush3.msk.msra.mxu1 %vm1592_vm7, %v3253_v4  ;;  %v1581_v59 = vsel %vm940_vm14, %v1565_v49, %v2172_v19 }
 0x4b7   :  { %v1265_v55 = vpop.permute.xlu0 %1264  ;;  %1929 = vmatprep.subr.msk.mxu1 %vm1592_vm7, %v3264_v0 }
 0x4b8   :  { %v1563_v36 = vmul.f32 %v2174_v40, %v1329_v62  ;;  %1930 = vmatpush3.msk.msra.mxu1 %vm1592_vm7, %v3264_v0  ;;  %v1311_v51 = vmul.f32 %v3394_v14, %v1265_v55  ;;  %v1310_v0 = vmul.f32 %v3395_v7, %v1263_v27 }
 0x4b9   :  { %1931 = vmatprep.subr.msk.mxu1 %vm1592_vm7, %v3272_v12 }
 0x4ba   :  { %1932 = vmatpush3.msk.msra.mxu1 %vm1592_vm7, %v3272_v12  ;;  %v1579_v4 = vsel %vm940_vm14, %v1563_v36, %v2174_v40  ;;  %v1327_v45 = vadd.f32 %v1311_v51, %v1231_v18  ;;  %v2176_v12 = vpop.eup %2175 }
 0x4bb   :  { %1933 = vmatprep.subr.msk.mxu1 %vm1592_vm7, %v3278_v15  ;;  %v2178_v20 = vpop.eup %2177 }
 0x4bc   :  { %1934 = vmatpush3.msk.msra.mxu1 %vm1592_vm7, %v3278_v15  ;;  %v1326_v15 = vadd.f32 %v1310_v0, %v1230_v21  ;;  %v1561_v2 = vmul.f32 %v2176_v12, %v1327_v45 }
 0x4bd   :  { %1935 = vmatprep.subr.msk.mxu1 %vm1592_vm7, %v3284_v16 }
 0x4be   :  { %1936 = vmatpush3.msk.msra.mxu1 %vm1592_vm7, %v3284_v16  ;;  %v1560_v3 = vmul.f32 %v2178_v20, %v1326_v15  ;;  %v1577_v16 = vsel %vm940_vm14, %v1561_v2, %v2176_v12 }
 0x4bf   :  { %1937 = vmatprep.subr.msk.mxu1 %vm1592_vm7, %v1581_v59 }
 0x4c0   :  { %1938 = vmatpush3.msk.msra.mxu1 %vm1592_vm7, %v1581_v59  ;;  %v1576_v28 = vsel %vm940_vm14, %v1560_v3, %v2178_v20 }
 0x4c1   :  { %1939 = vmatprep.subr.msk.mxu1 %vm1592_vm7, %v3289_v37 }
 0x4c2   :  { %1940 = vmatpush3.msk.msra.mxu1 %vm1592_vm7, %v3289_v37 }
 0x4c3   :  { %1941 = vmatprep.subr.msk.mxu1 %vm1592_vm7, %v1579_v4 }
 0x4c4   :  { %1942 = vmatpush3.msk.msra.mxu1 %vm1592_vm7, %v1579_v4 }
 0x4c5   :  { %1943 = vmatprep.subr.msk.mxu1 %vm1592_vm7, %v3292_v52 }
 0x4c6   :  { %1944 = vmatpush3.msk.msra.mxu1 %vm1592_vm7, %v3292_v52 }
 0x4c7   :  { %1945 = vmatprep.subr.msk.mxu1 %vm1592_vm7, %v1577_v16 }
 0x4c8   :  { %1946 = vmatpush3.msk.msra.mxu1 %vm1592_vm7, %v1577_v16 }
 0x4c9   :  { %1947 = vmatprep.subr.msk.mxu1 %vm1592_vm7, %v1576_v28 }
 0x4ca   :  { %1948 = vmatpush3.msk.msra.mxu1 %vm1592_vm7, %v1576_v28 }
 0x4cb   :  { %1950 = vmatmul.mubr.msk.f32.vlgmr.msra.gmra.mxu1 %vm1618_vm0, %v3391_v11 }
 0x58b   :  { %v1951_v8 = vpop.f32.mrf.mxu1 }
 0x58c   :  { %1703 = vst [vmem:[#allocation2 + $0x8] sm:$0xff] %v1951_v8 }
 0x58d   :  { %v1691_v5 = vpop.f32.mrf.mxu1 }
 0x58e   :  { %1702 = vst [vmem:[#allocation2] sm:$0xff] %v1691_v5 }
 0x58f   :  { %2190 = shalt.err (!%p2187_p4)
}
 0x590   :  { %s2212_s19 = smov 128   ;;  %s2213_s20 = smov 8  }
 0x591   :  { %1715 = dma.vmem_to_hbm [thread:$0]  %s1710_s17, 256, %s3368_s5, [#allocation3], %s2212_s19, %s2212_s19, %s2213_s20  }
 0x592   :  { %2199 = dma.done.wait [#allocation3], 256  }
 0x593   :  { %2200 = vsyncadd [#allocation3], 4294967040 }
 0x594   :  { %1719 = vsyncpa [#allocation3], 1 }

</bundles_post_ra>
